<compile_context>
chip_gen: v7x
topology: tpu7x:2x2x1
jax: 0.10.0
libtpu: 0.0.40
codegen_flags: <defaults>
</compile_context>

<pallas_src>
import functools
import math

import jax
import jax.numpy as jnp
from jax.experimental import pallas as pl
from jax.experimental.pallas import tpu as pltpu

NUM_HEADS = 8
LN_EPS = 1e-5


def _layernorm(x, gamma, beta):
    mu = jnp.mean(x, axis=-1, keepdims=True)
    var = jnp.mean((x - mu) ** 2, axis=-1, keepdims=True)
    return (x - mu) * jax.lax.rsqrt(var + LN_EPS) * gamma + beta


def encoder_kernel(x_ref,
                   wqkv_ref, bqkv_ref, wo_ref, w1_ref, w2_ref, vec_ref,
                   o_ref, *, num_heads, mxu_dtype):
    xb = x_ref[...]                               # (Bt, S, D) float32
    Bt, S, D = xb.shape
    hd = D // num_heads
    scale = 1.0 / math.sqrt(hd)
    M = Bt * S
    x2d = xb.reshape(M, D)                        # flatten sequences -> one big M for the MXU

    def mm(a, w):
        # Weights arrive pre-transposed and pre-cast to mxu_dtype by the wrapper;
        # only the activation is cast here, accumulation stays f32.
        return jnp.dot(a.astype(mxu_dtype), w, preferred_element_type=jnp.float32)

    # ---- fused QKV projection: (M, 3D) ----
    qkv = mm(x2d, wqkv_ref[...]) + bqkv_ref[...]          # bqkv is (1, 3D) -> broadcasts

    # Fold 1/sqrt(hd) into q once (instead of scaling every (S,S) score matrix).
    q_all = (qkv[:, :D] * scale).astype(mxu_dtype)
    k_all = qkv[:, D:2 * D].astype(mxu_dtype)
    v_all = qkv[:, 2 * D:].astype(mxu_dtype)

    # ---- multi-head self-attention ----
    # Per-head QK^T / softmax / PV (hd << 128, so head batching cannot raise MXU fill);
    # head outputs are merged with ONE lane-dim concat and ONE (M,D)@(D,D) out-projection.
    head_outs = []
    for h in range(num_heads):
        lo, hi = h * hd, (h + 1) * hd
        qh = q_all[:, lo:hi].reshape(Bt, S, hd)
        kh = k_all[:, lo:hi].reshape(Bt, S, hd)
        vh = v_all[:, lo:hi].reshape(Bt, S, hd)
        s = jnp.einsum('bqd,bkd->bqk', qh, kh,
                       preferred_element_type=jnp.float32)        # (Bt, S, S) f32
        s = s - jnp.max(s, axis=-1, keepdims=True)
        p = jnp.exp(s)                                            # f32 EUP
        p = p * pl.reciprocal(jnp.sum(p, axis=-1, keepdims=True), approx=True)
        oh = jnp.einsum('bqk,bkd->bqd', p.astype(mxu_dtype), vh,
                        preferred_element_type=jnp.float32)       # (Bt, S, hd)
        head_outs.append(oh.reshape(M, hd))
    # TODO(synk): for S >~ 1k, switch to flash-style KV tiling (online softmax over KV blocks)
    # so the f32 (S,S) score matrices never materialize — required under v7x's 64 MiB VMEM.
    attn = jnp.concatenate(head_outs, axis=-1)    # (M, D): single merge, not 8 partial matmuls

    vecs = vec_ref[...]                           # (7, D): bo, b1, b2, g1, be1, g2, be2
    attn_out = mm(attn, wo_ref[...]) + vecs[0:1]  # single merged output projection

    # ---- residual + LayerNorm 1 (kept in f32) ----
    x1 = _layernorm(x2d + attn_out, vecs[3:4], vecs[4:5])

    # ---- FFN: Linear -> ReLU -> Linear ----
    h1 = jnp.maximum(mm(x1, w1_ref[...]) + vecs[1:2], 0.0)
    ff = mm(h1, w2_ref[...]) + vecs[2:3]

    # ---- residual + LayerNorm 2 ----
    o_ref[...] = _layernorm(x1 + ff, vecs[5:6], vecs[6:7]).reshape(Bt, S, D)


def encoder_module_layer(x, params, *, num_heads=NUM_HEADS, block_b=None,
                         mxu_dtype=jnp.bfloat16):
    B, S, D = x.shape
    assert D % num_heads == 0
    # TODO(synk): for fully lane-dense (unmasked vst) stores, d_model should be a multiple of
    # 128 in production; at D=32 every activation row / output store uses 32 of 128 lanes.

    if block_b is None:
        # Target M = block_b*S ~ 512-1024 rows per grid step (real MXU M dim; ~85% of roofline
        # in measured tile sweeps at the 512-row class), shrunk to the largest divisor of B so
        # no batch padding (extra HBM read+write outside the kernel) is ever required.
        target_rows = 1024
        block_b = max(1, min(B, target_rows // max(S, 1)))
        while B % block_b:
            block_b -= 1
        # TODO(synk): on dual-TensorCore parts (v7x) cap block_b at B//2 when the halved
        # per-step M still meets the row target, so both cores get parallel grid steps.
    block_b = min(block_b, B)
    grid_b = pl.cdiv(B, block_b)
    b_pad = grid_b * block_b
    if b_pad != B:   # only reachable with an explicit block_b that does not divide B
        x = jnp.pad(x, ((0, b_pad - B), (0, 0), (0, 0)))

    # Layout plumbing done once outside pallas_call: pre-transpose weights (kernel never
    # transposes) and pre-cast them to the MXU dtype (halves weight DMA bytes + VMEM
    # residency, removes per-step casts). Biases / LN params stay f32 (added to f32 results)
    # and are packed into a single (7, D) array (one DMA/buffer instead of 8 padded ones).
    wqkv_t = params["wqkv"].T.astype(mxu_dtype)   # (D, 3D)
    wo_t = params["wo"].T.astype(mxu_dtype)       # (D, D)
    w1_t = params["w1"].T.astype(mxu_dtype)       # (D, D)
    w2_t = params["w2"].T.astype(mxu_dtype)       # (D, D)
    bqkv = params["bqkv"]                         # (1, 3D) f32
    vec = jnp.concatenate(
        [params["bo"], params["b1"], params["b2"],
         params["g1"], params["be1"], params["g2"], params["be2"]], axis=0)  # (7, D)

    param_list = [wqkv_t, bqkv, wo_t, w1_t, w2_t, vec]

    def full_spec(p):
        # Constant index_map: the block index never changes across the batch grid, so Pallas
        # does not re-issue weight DMAs per step (weights stay resident in VMEM).
        return pl.BlockSpec(p.shape, lambda b: (0, 0))

    in_specs = ([pl.BlockSpec((block_b, S, D), lambda b: (b, 0, 0))]
                + [full_spec(p) for p in param_list])
    # TODO(synk): if the streamed x/out block DMA shows up exposed after enlarging block_b,
    # sweep pipeline_mode=pl.Buffered(3) on the x/out BlockSpecs (weights stay resident).

    # Explicit VMEM budget: actual residency with headroom, capped per generation
    # (conservative when the physical size is unknown — assume v7x's 64 MiB per TC).
    m_rows = block_b * S
    weight_bytes = sum(int(p.size) * p.dtype.itemsize for p in param_list)
    act_bytes = m_rows * D * 4
    est = (2 * weight_bytes                      # double-buffered resident weights
           + 2 * 2 * act_bytes                   # double-buffered x / out blocks
           + 8 * act_bytes                       # qkv + q/k/v + attn/x1/h1/ff intermediates
           + 3 * block_b * S * S * 4)            # live (S,S) scores / probs for one head
    phys_vmem = 64 * 2 ** 20
    try:
        phys_vmem = int(pltpu.get_tpu_info().vmem_capacity_bytes)
    except Exception:
        pass
    vmem_limit = int(min(max(2 * est, 32 * 2 ** 20), int(0.75 * phys_vmem)))

    kernel = functools.partial(encoder_kernel, num_heads=num_heads, mxu_dtype=mxu_dtype)
    out = pl.pallas_call(
        kernel,
        out_shape=jax.ShapeDtypeStruct((b_pad, S, D), jnp.float32),
        grid_spec=pltpu.PrefetchScalarGridSpec(
            num_scalar_prefetch=0,
            grid=(grid_b,),
            in_specs=in_specs,
            out_specs=pl.BlockSpec((block_b, S, D), lambda b: (b, 0, 0)),
        ),
        compiler_params=pltpu.CompilerParams(
            dimension_semantics=("parallel",),
            vmem_limit_bytes=vmem_limit,
        ),
    )(x, *param_list)
    return out[:B]


def init_params(key, d_model):
    ks = jax.random.split(key, 6)
    scale = 0.1
    return {
        "wqkv": scale * jax.random.normal(ks[0], (3 * d_model, d_model), jnp.float32),
        "bqkv": scale * jax.random.normal(ks[1], (1, 3 * d_model), jnp.float32),
        "wo":   scale * jax.random.normal(ks[2], (d_model, d_model), jnp.float32),
        "bo":   scale * jax.random.normal(ks[3], (1, d_model), jnp.float32),
        "w1":   scale * jax.random.normal(ks[4], (d_model, d_model), jnp.float32),
        "b1":   jnp.zeros((1, d_model), jnp.float32),
        "w2":   scale * jax.random.normal(ks[5], (d_model, d_model), jnp.float32),
        "b2":   jnp.zeros((1, d_model), jnp.float32),
        "g1":   jnp.ones((1, d_model), jnp.float32),
        "be1":  jnp.zeros((1, d_model), jnp.float32),
        "g2":   jnp.ones((1, d_model), jnp.float32),
        "be2":  jnp.zeros((1, d_model), jnp.float32),
    }


def reference_forward(x, p, *, num_heads=NUM_HEADS):
    """Pure-JAX f32 reference mirroring PyTorch EncoderModuleLayer.forward (eval mode)."""
    B, S, D = x.shape
    hd = D // num_heads
    qkv = jnp.einsum("bsd,ed->bse", x, p["wqkv"]) + p["bqkv"][0]
    q = qkv[..., :D].reshape(B, S, num_heads, hd)
    k = qkv[..., D:2 * D].reshape(B, S, num_heads, hd)
    v = qkv[..., 2 * D:].reshape(B, S, num_heads, hd)
    scores = jnp.einsum("bqhd,bkhd->bhqk", q, k) / math.sqrt(hd)
    attn_w = jax.nn.softmax(scores, axis=-1)
    a = jnp.einsum("bhqk,bkhd->bqhd", attn_w, v).reshape(B, S, D)
    attn_out = jnp.einsum("bsd,ed->bse", a, p["wo"]) + p["bo"][0]
    x1 = _layernorm(x + attn_out, p["g1"][0], p["be1"][0])
    h = jax.nn.relu(jnp.einsum("bsd,ed->bse", x1, p["w1"]) + p["b1"][0])
    ff = jnp.einsum("bsd,ed->bse", h, p["w2"]) + p["b2"][0]
    return _layernorm(x1 + ff, p["g2"][0], p["be2"][0])


if __name__ == "__main__":
    B, S, D = 2, 8, 32   # batch=2, seq=8, d_model=32, num_heads=8 -> head_dim=4
    key = jax.random.PRNGKey(0)
    kx, kp = jax.random.split(key)
    x = jax.random.normal(kx, (B, S, D), jnp.float32)
    params = init_params(kp, D)

    ref = reference_forward(x, params, num_heads=NUM_HEADS)

    # Semantics check with f32 MXU inputs (only the approx EUP reciprocal deviates from exact).
    out_f32 = jax.block_until_ready(
        encoder_module_layer(x, params, num_heads=NUM_HEADS, mxu_dtype=jnp.float32))
    assert out_f32.shape == (B, S, D)
    assert jnp.allclose(out_f32, ref, atol=1e-2, rtol=1e-2), "f32 Pallas output mismatch"

    # Production path: bf16 MXU inputs/weights with f32 accumulation (looser tolerance).
    out = jax.block_until_ready(
        encoder_module_layer(x, params, num_heads=NUM_HEADS, mxu_dtype=jnp.bfloat16))
    assert out.shape == (B, S, D)
    assert jnp.allclose(out, ref, atol=5e-2, rtol=5e-2), "bf16 Pallas output mismatch"

    print("KERNEL_OK")
</pallas_src>

<mosaic_0001>
module attributes {stable_mosaic.version = 11 : i64} {
  func.func @encoder_kernel(%arg0: i32, %arg1: memref<2x8x32xf32, #tpu.memory_space<vmem>>, %arg2: memref<32x96xf32, #tpu.memory_space<vmem>>, %arg3: memref<1x96xf32, #tpu.memory_space<vmem>>, %arg4: memref<32x32xf32, #tpu.memory_space<vmem>>, %arg5: memref<32x32xf32, #tpu.memory_space<vmem>>, %arg6: memref<32x32xf32, #tpu.memory_space<vmem>>, %arg7: memref<7x32xf32, #tpu.memory_space<vmem>>, %arg8: memref<2x8x32xf32, #tpu.memory_space<vmem>>) attributes {dimension_semantics = [#tpu.dimension_semantics<parallel>], iteration_bounds = array<i64: 1>, scalar_prefetch = 0 : i64, scratch_operands = 0 : i64, tpu.core_type = #tpu.core_type<tc>, window_params = [{transform_indices = @transform_0, window_bounds = array<i64: 2, 8, 32>}, {pipeline_mode = #tpu.pipeline_mode<synchronous>, transform_indices = @transform_1, window_bounds = array<i64: 32, 96>}, {pipeline_mode = #tpu.pipeline_mode<synchronous>, transform_indices = @transform_2, window_bounds = array<i64: 1, 96>}, {pipeline_mode = #tpu.pipeline_mode<synchronous>, transform_indices = @transform_3, window_bounds = array<i64: 32, 32>}, {pipeline_mode = #tpu.pipeline_mode<synchronous>, transform_indices = @transform_4, window_bounds = array<i64: 32, 32>}, {pipeline_mode = #tpu.pipeline_mode<synchronous>, transform_indices = @transform_5, window_bounds = array<i64: 32, 32>}, {pipeline_mode = #tpu.pipeline_mode<synchronous>, transform_indices = @transform_6, window_bounds = array<i64: 7, 32>}, {transform_indices = @transform_7, window_bounds = array<i64: 2, 8, 32>}]} {
    %c0 = arith.constant 0 : index
    %c0_0 = arith.constant 0 : index
    %c0_1 = arith.constant 0 : index
    %0 = vector.load %arg1[%c0, %c0_0, %c0_1] : memref<2x8x32xf32, #tpu.memory_space<vmem>>, vector<2x8x32xf32>
    %1 = vector.shape_cast %0 : vector<2x8x32xf32> to vector<16x32xf32>
    %c0_2 = arith.constant 0 : index
    %c0_3 = arith.constant 0 : index
    %2 = vector.load %arg2[%c0_2, %c0_3] : memref<32x96xf32, #tpu.memory_space<vmem>>, vector<32x96xf32>
    %cst = arith.constant dense<0.000000e+00> : vector<16x96xf32>
    %3 = tpu.matmul %1, %2, %cst {dimension_numbers = #tpu.dot_dimension_numbers<[1], [0], [0], [1], [0, 0, 1, 1], [], []>} : vector<16x32xf32>, vector<32x96xf32>, vector<16x96xf32> -> vector<16x96xf32>
    %c0_4 = arith.constant 0 : index
    %c0_5 = arith.constant 0 : index
    %4 = vector.load %arg3[%c0_4, %c0_5] : memref<1x96xf32, #tpu.memory_space<vmem>>, vector<1x96xf32>
    %5 = vector.broadcast %4 : vector<1x96xf32> to vector<16x96xf32>
    %6 = arith.addf %3, %5 : vector<16x96xf32>
    %7 = vector.extract_strided_slice %6 {offsets = [0, 0], sizes = [16, 32], strides = [1, 1]} : vector<16x96xf32> to vector<16x32xf32>
    %cst_6 = arith.constant 5.000000e-01 : f32
    %8 = vector.broadcast %cst_6 : f32 to vector<16x32xf32>
    %9 = arith.mulf %7, %8 : vector<16x32xf32>
    %10 = vector.extract_strided_slice %6 {offsets = [0, 32], sizes = [16, 32], strides = [1, 1]} : vector<16x96xf32> to vector<16x32xf32>
    %11 = vector.extract_strided_slice %6 {offsets = [0, 64], sizes = [16, 32], strides = [1, 1]} : vector<16x96xf32> to vector<16x32xf32>
    %12 = vector.extract_strided_slice %9 {offsets = [0, 0], sizes = [16, 4], strides = [1, 1]} : vector<16x32xf32> to vector<16x4xf32>
    %13 = vector.shape_cast %12 : vector<16x4xf32> to vector<2x8x4xf32>
    %14 = vector.extract_strided_slice %10 {offsets = [0, 0], sizes = [16, 4], strides = [1, 1]} : vector<16x32xf32> to vector<16x4xf32>
    %15 = vector.shape_cast %14 : vector<16x4xf32> to vector<2x8x4xf32>
    %16 = vector.extract_strided_slice %11 {offsets = [0, 0], sizes = [16, 4], strides = [1, 1]} : vector<16x32xf32> to vector<16x4xf32>
    %17 = vector.shape_cast %16 : vector<16x4xf32> to vector<2x8x4xf32>
    "tpu.trace_start"() <{level = 10 : i32, message = "bqd,bkd->bqk"}> : () -> ()
    %cst_7 = arith.constant dense<0.000000e+00> : vector<2x8x8xf32>
    %18 = tpu.matmul %13, %15, %cst_7 {dimension_numbers = #tpu.dot_dimension_numbers<[2], [2], [1], [1], [0, 0, 0, 1, 1, 1], [0], [0]>} : vector<2x8x4xf32>, vector<2x8x4xf32>, vector<2x8x8xf32> -> vector<2x8x8xf32>
    "tpu.trace_stop"() : () -> ()
    %cst_8 = arith.constant dense<0xFF800000> : vector<2x8xf32>
    %19 = vector.multi_reduction <maximumf>, %18, %cst_8 [2] : vector<2x8x8xf32> to vector<2x8xf32>
    %20 = vector.shape_cast %19 : vector<2x8xf32> to vector<2x8x1xf32>
    %21 = vector.broadcast %20 : vector<2x8x1xf32> to vector<2x8x8xf32>
    %22 = arith.subf %18, %21 : vector<2x8x8xf32>
    %23 = math.exp %22 : vector<2x8x8xf32>
    %cst_9 = arith.constant dense<0.000000e+00> : vector<2x8xf32>
    %24 = vector.multi_reduction <add>, %23, %cst_9 [2] : vector<2x8x8xf32> to vector<2x8xf32>
    %25 = vector.shape_cast %24 : vector<2x8xf32> to vector<2x8x1xf32>
    %26 = tpu.reciprocal %25 {approx = true} : vector<2x8x1xf32> -> vector<2x8x1xf32>
    %27 = vector.broadcast %26 : vector<2x8x1xf32> to vector<2x8x8xf32>
    %28 = arith.mulf %23, %27 : vector<2x8x8xf32>
    "tpu.trace_start"() <{level = 10 : i32, message = "bqk,bkd->bqd"}> : () -> ()
    %cst_10 = arith.constant dense<0.000000e+00> : vector<2x8x4xf32>
    %29 = tpu.matmul %28, %17, %cst_10 {dimension_numbers = #tpu.dot_dimension_numbers<[2], [1], [1], [2], [0, 0, 0, 1, 1, 2], [0], [0]>} : vector<2x8x8xf32>, vector<2x8x4xf32>, vector<2x8x4xf32> -> vector<2x8x4xf32>
    "tpu.trace_stop"() : () -> ()
    %30 = vector.shape_cast %29 : vector<2x8x4xf32> to vector<16x4xf32>
    %31 = vector.extract_strided_slice %9 {offsets = [0, 4], sizes = [16, 4], strides = [1, 1]} : vector<16x32xf32> to vector<16x4xf32>
    %32 = vector.shape_cast %31 : vector<16x4xf32> to vector<2x8x4xf32>
    %33 = vector.extract_strided_slice %10 {offsets = [0, 4], sizes = [16, 4], strides = [1, 1]} : vector<16x32xf32> to vector<16x4xf32>
    %34 = vector.shape_cast %33 : vector<16x4xf32> to vector<2x8x4xf32>
    %35 = vector.extract_strided_slice %11 {offsets = [0, 4], sizes = [16, 4], strides = [1, 1]} : vector<16x32xf32> to vector<16x4xf32>
    %36 = vector.shape_cast %35 : vector<16x4xf32> to vector<2x8x4xf32>
    "tpu.trace_start"() <{level = 10 : i32, message = "bqd,bkd->bqk"}> : () -> ()
    %cst_11 = arith.constant dense<0.000000e+00> : vector<2x8x8xf32>
    %37 = tpu.matmul %32, %34, %cst_11 {dimension_numbers = #tpu.dot_dimension_numbers<[2], [2], [1], [1], [0, 0, 0, 1, 1, 1], [0], [0]>} : vector<2x8x4xf32>, vector<2x8x4xf32>, vector<2x8x8xf32> -> vector<2x8x8xf32>
    "tpu.trace_stop"() : () -> ()
    %cst_12 = arith.constant dense<0xFF800000> : vector<2x8xf32>
    %38 = vector.multi_reduction <maximumf>, %37, %cst_12 [2] : vector<2x8x8xf32> to vector<2x8xf32>
    %39 = vector.shape_cast %38 : vector<2x8xf32> to vector<2x8x1xf32>
    %40 = vector.broadcast %39 : vector<2x8x1xf32> to vector<2x8x8xf32>
    %41 = arith.subf %37, %40 : vector<2x8x8xf32>
    %42 = math.exp %41 : vector<2x8x8xf32>
    %cst_13 = arith.constant dense<0.000000e+00> : vector<2x8xf32>
    %43 = vector.multi_reduction <add>, %42, %cst_13 [2] : vector<2x8x8xf32> to vector<2x8xf32>
    %44 = vector.shape_cast %43 : vector<2x8xf32> to vector<2x8x1xf32>
    %45 = tpu.reciprocal %44 {approx = true} : vector<2x8x1xf32> -> vector<2x8x1xf32>
    %46 = vector.broadcast %45 : vector<2x8x1xf32> to vector<2x8x8xf32>
    %47 = arith.mulf %42, %46 : vector<2x8x8xf32>
    "tpu.trace_start"() <{level = 10 : i32, message = "bqk,bkd->bqd"}> : () -> ()
    %cst_14 = arith.constant dense<0.000000e+00> : vector<2x8x4xf32>
    %48 = tpu.matmul %47, %36, %cst_14 {dimension_numbers = #tpu.dot_dimension_numbers<[2], [1], [1], [2], [0, 0, 0, 1, 1, 2], [0], [0]>} : vector<2x8x8xf32>, vector<2x8x4xf32>, vector<2x8x4xf32> -> vector<2x8x4xf32>
    "tpu.trace_stop"() : () -> ()
    %49 = vector.shape_cast %48 : vector<2x8x4xf32> to vector<16x4xf32>
    %50 = vector.extract_strided_slice %9 {offsets = [0, 8], sizes = [16, 4], strides = [1, 1]} : vector<16x32xf32> to vector<16x4xf32>
    %51 = vector.shape_cast %50 : vector<16x4xf32> to vector<2x8x4xf32>
    %52 = vector.extract_strided_slice %10 {offsets = [0, 8], sizes = [16, 4], strides = [1, 1]} : vector<16x32xf32> to vector<16x4xf32>
    %53 = vector.shape_cast %52 : vector<16x4xf32> to vector<2x8x4xf32>
    %54 = vector.extract_strided_slice %11 {offsets = [0, 8], sizes = [16, 4], strides = [1, 1]} : vector<16x32xf32> to vector<16x4xf32>
    %55 = vector.shape_cast %54 : vector<16x4xf32> to vector<2x8x4xf32>
    "tpu.trace_start"() <{level = 10 : i32, message = "bqd,bkd->bqk"}> : () -> ()
    %cst_15 = arith.constant dense<0.000000e+00> : vector<2x8x8xf32>
    %56 = tpu.matmul %51, %53, %cst_15 {dimension_numbers = #tpu.dot_dimension_numbers<[2], [2], [1], [1], [0, 0, 0, 1, 1, 1], [0], [0]>} : vector<2x8x4xf32>, vector<2x8x4xf32>, vector<2x8x8xf32> -> vector<2x8x8xf32>
    "tpu.trace_stop"() : () -> ()
    %cst_16 = arith.constant dense<0xFF800000> : vector<2x8xf32>
    %57 = vector.multi_reduction <maximumf>, %56, %cst_16 [2] : vector<2x8x8xf32> to vector<2x8xf32>
    %58 = vector.shape_cast %57 : vector<2x8xf32> to vector<2x8x1xf32>
    %59 = vector.broadcast %58 : vector<2x8x1xf32> to vector<2x8x8xf32>
    %60 = arith.subf %56, %59 : vector<2x8x8xf32>
    %61 = math.exp %60 : vector<2x8x8xf32>
    %cst_17 = arith.constant dense<0.000000e+00> : vector<2x8xf32>
    %62 = vector.multi_reduction <add>, %61, %cst_17 [2] : vector<2x8x8xf32> to vector<2x8xf32>
    %63 = vector.shape_cast %62 : vector<2x8xf32> to vector<2x8x1xf32>
    %64 = tpu.reciprocal %63 {approx = true} : vector<2x8x1xf32> -> vector<2x8x1xf32>
    %65 = vector.broadcast %64 : vector<2x8x1xf32> to vector<2x8x8xf32>
    %66 = arith.mulf %61, %65 : vector<2x8x8xf32>
    "tpu.trace_start"() <{level = 10 : i32, message = "bqk,bkd->bqd"}> : () -> ()
    %cst_18 = arith.constant dense<0.000000e+00> : vector<2x8x4xf32>
    %67 = tpu.matmul %66, %55, %cst_18 {dimension_numbers = #tpu.dot_dimension_numbers<[2], [1], [1], [2], [0, 0, 0, 1, 1, 2], [0], [0]>} : vector<2x8x8xf32>, vector<2x8x4xf32>, vector<2x8x4xf32> -> vector<2x8x4xf32>
    "tpu.trace_stop"() : () -> ()
    %68 = vector.shape_cast %67 : vector<2x8x4xf32> to vector<16x4xf32>
    %69 = vector.extract_strided_slice %9 {offsets = [0, 12], sizes = [16, 4], strides = [1, 1]} : vector<16x32xf32> to vector<16x4xf32>
    %70 = vector.shape_cast %69 : vector<16x4xf32> to vector<2x8x4xf32>
    %71 = vector.extract_strided_slice %10 {offsets = [0, 12], sizes = [16, 4], strides = [1, 1]} : vector<16x32xf32> to vector<16x4xf32>
    %72 = vector.shape_cast %71 : vector<16x4xf32> to vector<2x8x4xf32>
    %73 = vector.extract_strided_slice %11 {offsets = [0, 12], sizes = [16, 4], strides = [1, 1]} : vector<16x32xf32> to vector<16x4xf32>
    %74 = vector.shape_cast %73 : vector<16x4xf32> to vector<2x8x4xf32>
    "tpu.trace_start"() <{level = 10 : i32, message = "bqd,bkd->bqk"}> : () -> ()
    %cst_19 = arith.constant dense<0.000000e+00> : vector<2x8x8xf32>
    %75 = tpu.matmul %70, %72, %cst_19 {dimension_numbers = #tpu.dot_dimension_numbers<[2], [2], [1], [1], [0, 0, 0, 1, 1, 1], [0], [0]>} : vector<2x8x4xf32>, vector<2x8x4xf32>, vector<2x8x8xf32> -> vector<2x8x8xf32>
    "tpu.trace_stop"() : () -> ()
    %cst_20 = arith.constant dense<0xFF800000> : vector<2x8xf32>
    %76 = vector.multi_reduction <maximumf>, %75, %cst_20 [2] : vector<2x8x8xf32> to vector<2x8xf32>
    %77 = vector.shape_cast %76 : vector<2x8xf32> to vector<2x8x1xf32>
    %78 = vector.broadcast %77 : vector<2x8x1xf32> to vector<2x8x8xf32>
    %79 = arith.subf %75, %78 : vector<2x8x8xf32>
    %80 = math.exp %79 : vector<2x8x8xf32>
    %cst_21 = arith.constant dense<0.000000e+00> : vector<2x8xf32>
    %81 = vector.multi_reduction <add>, %80, %cst_21 [2] : vector<2x8x8xf32> to vector<2x8xf32>
    %82 = vector.shape_cast %81 : vector<2x8xf32> to vector<2x8x1xf32>
    %83 = tpu.reciprocal %82 {approx = true} : vector<2x8x1xf32> -> vector<2x8x1xf32>
    %84 = vector.broadcast %83 : vector<2x8x1xf32> to vector<2x8x8xf32>
    %85 = arith.mulf %80, %84 : vector<2x8x8xf32>
    "tpu.trace_start"() <{level = 10 : i32, message = "bqk,bkd->bqd"}> : () -> ()
    %cst_22 = arith.constant dense<0.000000e+00> : vector<2x8x4xf32>
    %86 = tpu.matmul %85, %74, %cst_22 {dimension_numbers = #tpu.dot_dimension_numbers<[2], [1], [1], [2], [0, 0, 0, 1, 1, 2], [0], [0]>} : vector<2x8x8xf32>, vector<2x8x4xf32>, vector<2x8x4xf32> -> vector<2x8x4xf32>
    "tpu.trace_stop"() : () -> ()
    %87 = vector.shape_cast %86 : vector<2x8x4xf32> to vector<16x4xf32>
    %88 = vector.extract_strided_slice %9 {offsets = [0, 16], sizes = [16, 4], strides = [1, 1]} : vector<16x32xf32> to vector<16x4xf32>
    %89 = vector.shape_cast %88 : vector<16x4xf32> to vector<2x8x4xf32>
    %90 = vector.extract_strided_slice %10 {offsets = [0, 16], sizes = [16, 4], strides = [1, 1]} : vector<16x32xf32> to vector<16x4xf32>
    %91 = vector.shape_cast %90 : vector<16x4xf32> to vector<2x8x4xf32>
    %92 = vector.extract_strided_slice %11 {offsets = [0, 16], sizes = [16, 4], strides = [1, 1]} : vector<16x32xf32> to vector<16x4xf32>
    %93 = vector.shape_cast %92 : vector<16x4xf32> to vector<2x8x4xf32>
    "tpu.trace_start"() <{level = 10 : i32, message = "bqd,bkd->bqk"}> : () -> ()
    %cst_23 = arith.constant dense<0.000000e+00> : vector<2x8x8xf32>
    %94 = tpu.matmul %89, %91, %cst_23 {dimension_numbers = #tpu.dot_dimension_numbers<[2], [2], [1], [1], [0, 0, 0, 1, 1, 1], [0], [0]>} : vector<2x8x4xf32>, vector<2x8x4xf32>, vector<2x8x8xf32> -> vector<2x8x8xf32>
    "tpu.trace_stop"() : () -> ()
    %cst_24 = arith.constant dense<0xFF800000> : vector<2x8xf32>
    %95 = vector.multi_reduction <maximumf>, %94, %cst_24 [2] : vector<2x8x8xf32> to vector<2x8xf32>
    %96 = vector.shape_cast %95 : vector<2x8xf32> to vector<2x8x1xf32>
    %97 = vector.broadcast %96 : vector<2x8x1xf32> to vector<2x8x8xf32>
    %98 = arith.subf %94, %97 : vector<2x8x8xf32>
    %99 = math.exp %98 : vector<2x8x8xf32>
    %cst_25 = arith.constant dense<0.000000e+00> : vector<2x8xf32>
    %100 = vector.multi_reduction <add>, %99, %cst_25 [2] : vector<2x8x8xf32> to vector<2x8xf32>
    %101 = vector.shape_cast %100 : vector<2x8xf32> to vector<2x8x1xf32>
    %102 = tpu.reciprocal %101 {approx = true} : vector<2x8x1xf32> -> vector<2x8x1xf32>
    %103 = vector.broadcast %102 : vector<2x8x1xf32> to vector<2x8x8xf32>
    %104 = arith.mulf %99, %103 : vector<2x8x8xf32>
    "tpu.trace_start"() <{level = 10 : i32, message = "bqk,bkd->bqd"}> : () -> ()
    %cst_26 = arith.constant dense<0.000000e+00> : vector<2x8x4xf32>
    %105 = tpu.matmul %104, %93, %cst_26 {dimension_numbers = #tpu.dot_dimension_numbers<[2], [1], [1], [2], [0, 0, 0, 1, 1, 2], [0], [0]>} : vector<2x8x8xf32>, vector<2x8x4xf32>, vector<2x8x4xf32> -> vector<2x8x4xf32>
    "tpu.trace_stop"() : () -> ()
    %106 = vector.shape_cast %105 : vector<2x8x4xf32> to vector<16x4xf32>
    %107 = vector.extract_strided_slice %9 {offsets = [0, 20], sizes = [16, 4], strides = [1, 1]} : vector<16x32xf32> to vector<16x4xf32>
    %108 = vector.shape_cast %107 : vector<16x4xf32> to vector<2x8x4xf32>
    %109 = vector.extract_strided_slice %10 {offsets = [0, 20], sizes = [16, 4], strides = [1, 1]} : vector<16x32xf32> to vector<16x4xf32>
    %110 = vector.shape_cast %109 : vector<16x4xf32> to vector<2x8x4xf32>
    %111 = vector.extract_strided_slice %11 {offsets = [0, 20], sizes = [16, 4], strides = [1, 1]} : vector<16x32xf32> to vector<16x4xf32>
    %112 = vector.shape_cast %111 : vector<16x4xf32> to vector<2x8x4xf32>
    "tpu.trace_start"() <{level = 10 : i32, message = "bqd,bkd->bqk"}> : () -> ()
    %cst_27 = arith.constant dense<0.000000e+00> : vector<2x8x8xf32>
    %113 = tpu.matmul %108, %110, %cst_27 {dimension_numbers = #tpu.dot_dimension_numbers<[2], [2], [1], [1], [0, 0, 0, 1, 1, 1], [0], [0]>} : vector<2x8x4xf32>, vector<2x8x4xf32>, vector<2x8x8xf32> -> vector<2x8x8xf32>
    "tpu.trace_stop"() : () -> ()
    %cst_28 = arith.constant dense<0xFF800000> : vector<2x8xf32>
    %114 = vector.multi_reduction <maximumf>, %113, %cst_28 [2] : vector<2x8x8xf32> to vector<2x8xf32>
    %115 = vector.shape_cast %114 : vector<2x8xf32> to vector<2x8x1xf32>
    %116 = vector.broadcast %115 : vector<2x8x1xf32> to vector<2x8x8xf32>
    %117 = arith.subf %113, %116 : vector<2x8x8xf32>
    %118 = math.exp %117 : vector<2x8x8xf32>
    %cst_29 = arith.constant dense<0.000000e+00> : vector<2x8xf32>
    %119 = vector.multi_reduction <add>, %118, %cst_29 [2] : vector<2x8x8xf32> to vector<2x8xf32>
    %120 = vector.shape_cast %119 : vector<2x8xf32> to vector<2x8x1xf32>
    %121 = tpu.reciprocal %120 {approx = true} : vector<2x8x1xf32> -> vector<2x8x1xf32>
    %122 = vector.broadcast %121 : vector<2x8x1xf32> to vector<2x8x8xf32>
    %123 = arith.mulf %118, %122 : vector<2x8x8xf32>
    "tpu.trace_start"() <{level = 10 : i32, message = "bqk,bkd->bqd"}> : () -> ()
    %cst_30 = arith.constant dense<0.000000e+00> : vector<2x8x4xf32>
    %124 = tpu.matmul %123, %112, %cst_30 {dimension_numbers = #tpu.dot_dimension_numbers<[2], [1], [1], [2], [0, 0, 0, 1, 1, 2], [0], [0]>} : vector<2x8x8xf32>, vector<2x8x4xf32>, vector<2x8x4xf32> -> vector<2x8x4xf32>
    "tpu.trace_stop"() : () -> ()
    %125 = vector.shape_cast %124 : vector<2x8x4xf32> to vector<16x4xf32>
    %126 = vector.extract_strided_slice %9 {offsets = [0, 24], sizes = [16, 4], strides = [1, 1]} : vector<16x32xf32> to vector<16x4xf32>
    %127 = vector.shape_cast %126 : vector<16x4xf32> to vector<2x8x4xf32>
    %128 = vector.extract_strided_slice %10 {offsets = [0, 24], sizes = [16, 4], strides = [1, 1]} : vector<16x32xf32> to vector<16x4xf32>
    %129 = vector.shape_cast %128 : vector<16x4xf32> to vector<2x8x4xf32>
    %130 = vector.extract_strided_slice %11 {offsets = [0, 24], sizes = [16, 4], strides = [1, 1]} : vector<16x32xf32> to vector<16x4xf32>
    %131 = vector.shape_cast %130 : vector<16x4xf32> to vector<2x8x4xf32>
    "tpu.trace_start"() <{level = 10 : i32, message = "bqd,bkd->bqk"}> : () -> ()
    %cst_31 = arith.constant dense<0.000000e+00> : vector<2x8x8xf32>
    %132 = tpu.matmul %127, %129, %cst_31 {dimension_numbers = #tpu.dot_dimension_numbers<[2], [2], [1], [1], [0, 0, 0, 1, 1, 1], [0], [0]>} : vector<2x8x4xf32>, vector<2x8x4xf32>, vector<2x8x8xf32> -> vector<2x8x8xf32>
    "tpu.trace_stop"() : () -> ()
    %cst_32 = arith.constant dense<0xFF800000> : vector<2x8xf32>
    %133 = vector.multi_reduction <maximumf>, %132, %cst_32 [2] : vector<2x8x8xf32> to vector<2x8xf32>
    %134 = vector.shape_cast %133 : vector<2x8xf32> to vector<2x8x1xf32>
    %135 = vector.broadcast %134 : vector<2x8x1xf32> to vector<2x8x8xf32>
    %136 = arith.subf %132, %135 : vector<2x8x8xf32>
    %137 = math.exp %136 : vector<2x8x8xf32>
    %cst_33 = arith.constant dense<0.000000e+00> : vector<2x8xf32>
    %138 = vector.multi_reduction <add>, %137, %cst_33 [2] : vector<2x8x8xf32> to vector<2x8xf32>
    %139 = vector.shape_cast %138 : vector<2x8xf32> to vector<2x8x1xf32>
    %140 = tpu.reciprocal %139 {approx = true} : vector<2x8x1xf32> -> vector<2x8x1xf32>
    %141 = vector.broadcast %140 : vector<2x8x1xf32> to vector<2x8x8xf32>
    %142 = arith.mulf %137, %141 : vector<2x8x8xf32>
    "tpu.trace_start"() <{level = 10 : i32, message = "bqk,bkd->bqd"}> : () -> ()
    %cst_34 = arith.constant dense<0.000000e+00> : vector<2x8x4xf32>
    %143 = tpu.matmul %142, %131, %cst_34 {dimension_numbers = #tpu.dot_dimension_numbers<[2], [1], [1], [2], [0, 0, 0, 1, 1, 2], [0], [0]>} : vector<2x8x8xf32>, vector<2x8x4xf32>, vector<2x8x4xf32> -> vector<2x8x4xf32>
    "tpu.trace_stop"() : () -> ()
    %144 = vector.shape_cast %143 : vector<2x8x4xf32> to vector<16x4xf32>
    %145 = vector.extract_strided_slice %9 {offsets = [0, 28], sizes = [16, 4], strides = [1, 1]} : vector<16x32xf32> to vector<16x4xf32>
    %146 = vector.shape_cast %145 : vector<16x4xf32> to vector<2x8x4xf32>
    %147 = vector.extract_strided_slice %10 {offsets = [0, 28], sizes = [16, 4], strides = [1, 1]} : vector<16x32xf32> to vector<16x4xf32>
    %148 = vector.shape_cast %147 : vector<16x4xf32> to vector<2x8x4xf32>
    %149 = vector.extract_strided_slice %11 {offsets = [0, 28], sizes = [16, 4], strides = [1, 1]} : vector<16x32xf32> to vector<16x4xf32>
    %150 = vector.shape_cast %149 : vector<16x4xf32> to vector<2x8x4xf32>
    "tpu.trace_start"() <{level = 10 : i32, message = "bqd,bkd->bqk"}> : () -> ()
    %cst_35 = arith.constant dense<0.000000e+00> : vector<2x8x8xf32>
    %151 = tpu.matmul %146, %148, %cst_35 {dimension_numbers = #tpu.dot_dimension_numbers<[2], [2], [1], [1], [0, 0, 0, 1, 1, 1], [0], [0]>} : vector<2x8x4xf32>, vector<2x8x4xf32>, vector<2x8x8xf32> -> vector<2x8x8xf32>
    "tpu.trace_stop"() : () -> ()
    %cst_36 = arith.constant dense<0xFF800000> : vector<2x8xf32>
    %152 = vector.multi_reduction <maximumf>, %151, %cst_36 [2] : vector<2x8x8xf32> to vector<2x8xf32>
    %153 = vector.shape_cast %152 : vector<2x8xf32> to vector<2x8x1xf32>
    %154 = vector.broadcast %153 : vector<2x8x1xf32> to vector<2x8x8xf32>
    %155 = arith.subf %151, %154 : vector<2x8x8xf32>
    %156 = math.exp %155 : vector<2x8x8xf32>
    %cst_37 = arith.constant dense<0.000000e+00> : vector<2x8xf32>
    %157 = vector.multi_reduction <add>, %156, %cst_37 [2] : vector<2x8x8xf32> to vector<2x8xf32>
    %158 = vector.shape_cast %157 : vector<2x8xf32> to vector<2x8x1xf32>
    %159 = tpu.reciprocal %158 {approx = true} : vector<2x8x1xf32> -> vector<2x8x1xf32>
    %160 = vector.broadcast %159 : vector<2x8x1xf32> to vector<2x8x8xf32>
    %161 = arith.mulf %156, %160 : vector<2x8x8xf32>
    "tpu.trace_start"() <{level = 10 : i32, message = "bqk,bkd->bqd"}> : () -> ()
    %cst_38 = arith.constant dense<0.000000e+00> : vector<2x8x4xf32>
    %162 = tpu.matmul %161, %150, %cst_38 {dimension_numbers = #tpu.dot_dimension_numbers<[2], [1], [1], [2], [0, 0, 0, 1, 1, 2], [0], [0]>} : vector<2x8x8xf32>, vector<2x8x4xf32>, vector<2x8x4xf32> -> vector<2x8x4xf32>
    "tpu.trace_stop"() : () -> ()
    %163 = vector.shape_cast %162 : vector<2x8x4xf32> to vector<16x4xf32>
    %164 = tpu.concatenate %30, %49, %68, %87, %106, %125, %144, %163 in 1 : vector<16x4xf32>, vector<16x4xf32>, vector<16x4xf32>, vector<16x4xf32>, vector<16x4xf32>, vector<16x4xf32>, vector<16x4xf32>, vector<16x4xf32> -> vector<16x32xf32>
    %c0_39 = arith.constant 0 : index
    %c0_40 = arith.constant 0 : index
    %165 = vector.load %arg7[%c0_39, %c0_40] : memref<7x32xf32, #tpu.memory_space<vmem>>, vector<7x32xf32>
    %c0_41 = arith.constant 0 : index
    %c0_42 = arith.constant 0 : index
    %166 = vector.load %arg4[%c0_41, %c0_42] : memref<32x32xf32, #tpu.memory_space<vmem>>, vector<32x32xf32>
    %cst_43 = arith.constant dense<0.000000e+00> : vector<16x32xf32>
    %167 = tpu.matmul %164, %166, %cst_43 {dimension_numbers = #tpu.dot_dimension_numbers<[1], [0], [0], [1], [0, 0, 1, 1], [], []>} : vector<16x32xf32>, vector<32x32xf32>, vector<16x32xf32> -> vector<16x32xf32>
    %168 = vector.extract_strided_slice %165 {offsets = [0, 0], sizes = [1, 32], strides = [1, 1]} : vector<7x32xf32> to vector<1x32xf32>
    %169 = vector.broadcast %168 : vector<1x32xf32> to vector<16x32xf32>
    %170 = arith.addf %167, %169 : vector<16x32xf32>
    %171 = arith.addf %1, %170 : vector<16x32xf32>
    %172 = vector.extract_strided_slice %165 {offsets = [3, 0], sizes = [1, 32], strides = [1, 1]} : vector<7x32xf32> to vector<1x32xf32>
    %173 = vector.extract_strided_slice %165 {offsets = [4, 0], sizes = [1, 32], strides = [1, 1]} : vector<7x32xf32> to vector<1x32xf32>
    %cst_44 = arith.constant dense<0.000000e+00> : vector<16xf32>
    %174 = vector.multi_reduction <add>, %171, %cst_44 [1] : vector<16x32xf32> to vector<16xf32>
    %175 = vector.shape_cast %174 : vector<16xf32> to vector<16x1xf32>
    %cst_45 = arith.constant 3.200000e+01 : f32
    %176 = vector.broadcast %cst_45 : f32 to vector<16x1xf32>
    %177 = arith.divf %175, %176 : vector<16x1xf32>
    %178 = vector.broadcast %177 : vector<16x1xf32> to vector<16x32xf32>
    %179 = arith.subf %171, %178 : vector<16x32xf32>
    %180 = arith.mulf %179, %179 : vector<16x32xf32>
    %cst_46 = arith.constant dense<0.000000e+00> : vector<16xf32>
    %181 = vector.multi_reduction <add>, %180, %cst_46 [1] : vector<16x32xf32> to vector<16xf32>
    %182 = vector.shape_cast %181 : vector<16xf32> to vector<16x1xf32>
    %cst_47 = arith.constant 3.200000e+01 : f32
    %183 = vector.broadcast %cst_47 : f32 to vector<16x1xf32>
    %184 = arith.divf %182, %183 : vector<16x1xf32>
    %185 = vector.broadcast %177 : vector<16x1xf32> to vector<16x32xf32>
    %186 = arith.subf %171, %185 : vector<16x32xf32>
    %cst_48 = arith.constant 9.99999974E-6 : f32
    %187 = vector.broadcast %cst_48 : f32 to vector<16x1xf32>
    %188 = arith.addf %184, %187 : vector<16x1xf32>
    %189 = math.rsqrt %188 : vector<16x1xf32>
    %190 = vector.broadcast %189 : vector<16x1xf32> to vector<16x32xf32>
    %191 = arith.mulf %186, %190 : vector<16x32xf32>
    %192 = vector.broadcast %172 : vector<1x32xf32> to vector<16x32xf32>
    %193 = arith.mulf %191, %192 : vector<16x32xf32>
    %194 = vector.broadcast %173 : vector<1x32xf32> to vector<16x32xf32>
    %195 = arith.addf %193, %194 : vector<16x32xf32>
    %c0_49 = arith.constant 0 : index
    %c0_50 = arith.constant 0 : index
    %196 = vector.load %arg5[%c0_49, %c0_50] : memref<32x32xf32, #tpu.memory_space<vmem>>, vector<32x32xf32>
    %cst_51 = arith.constant dense<0.000000e+00> : vector<16x32xf32>
    %197 = tpu.matmul %195, %196, %cst_51 {dimension_numbers = #tpu.dot_dimension_numbers<[1], [0], [0], [1], [0, 0, 1, 1], [], []>} : vector<16x32xf32>, vector<32x32xf32>, vector<16x32xf32> -> vector<16x32xf32>
    %198 = vector.extract_strided_slice %165 {offsets = [1, 0], sizes = [1, 32], strides = [1, 1]} : vector<7x32xf32> to vector<1x32xf32>
    %199 = vector.broadcast %198 : vector<1x32xf32> to vector<16x32xf32>
    %200 = arith.addf %197, %199 : vector<16x32xf32>
    %cst_52 = arith.constant 0.000000e+00 : f32
    %201 = vector.broadcast %cst_52 : f32 to vector<16x32xf32>
    %202 = arith.maximumf %200, %201 : vector<16x32xf32>
    %c0_53 = arith.constant 0 : index
    %c0_54 = arith.constant 0 : index
    %203 = vector.load %arg6[%c0_53, %c0_54] : memref<32x32xf32, #tpu.memory_space<vmem>>, vector<32x32xf32>
    %cst_55 = arith.constant dense<0.000000e+00> : vector<16x32xf32>
    %204 = tpu.matmul %202, %203, %cst_55 {dimension_numbers = #tpu.dot_dimension_numbers<[1], [0], [0], [1], [0, 0, 1, 1], [], []>} : vector<16x32xf32>, vector<32x32xf32>, vector<16x32xf32> -> vector<16x32xf32>
    %205 = vector.extract_strided_slice %165 {offsets = [2, 0], sizes = [1, 32], strides = [1, 1]} : vector<7x32xf32> to vector<1x32xf32>
    %206 = vector.broadcast %205 : vector<1x32xf32> to vector<16x32xf32>
    %207 = arith.addf %204, %206 : vector<16x32xf32>
    %208 = arith.addf %195, %207 : vector<16x32xf32>
    %209 = vector.extract_strided_slice %165 {offsets = [5, 0], sizes = [1, 32], strides = [1, 1]} : vector<7x32xf32> to vector<1x32xf32>
    %210 = vector.extract_strided_slice %165 {offsets = [6, 0], sizes = [1, 32], strides = [1, 1]} : vector<7x32xf32> to vector<1x32xf32>
    %cst_56 = arith.constant dense<0.000000e+00> : vector<16xf32>
    %211 = vector.multi_reduction <add>, %208, %cst_56 [1] : vector<16x32xf32> to vector<16xf32>
    %212 = vector.shape_cast %211 : vector<16xf32> to vector<16x1xf32>
    %cst_57 = arith.constant 3.200000e+01 : f32
    %213 = vector.broadcast %cst_57 : f32 to vector<16x1xf32>
    %214 = arith.divf %212, %213 : vector<16x1xf32>
    %215 = vector.broadcast %214 : vector<16x1xf32> to vector<16x32xf32>
    %216 = arith.subf %208, %215 : vector<16x32xf32>
    %217 = arith.mulf %216, %216 : vector<16x32xf32>
    %cst_58 = arith.constant dense<0.000000e+00> : vector<16xf32>
    %218 = vector.multi_reduction <add>, %217, %cst_58 [1] : vector<16x32xf32> to vector<16xf32>
    %219 = vector.shape_cast %218 : vector<16xf32> to vector<16x1xf32>
    %cst_59 = arith.constant 3.200000e+01 : f32
    %220 = vector.broadcast %cst_59 : f32 to vector<16x1xf32>
    %221 = arith.divf %219, %220 : vector<16x1xf32>
    %222 = vector.broadcast %214 : vector<16x1xf32> to vector<16x32xf32>
    %223 = arith.subf %208, %222 : vector<16x32xf32>
    %cst_60 = arith.constant 9.99999974E-6 : f32
    %224 = vector.broadcast %cst_60 : f32 to vector<16x1xf32>
    %225 = arith.addf %221, %224 : vector<16x1xf32>
    %226 = math.rsqrt %225 : vector<16x1xf32>
    %227 = vector.broadcast %226 : vector<16x1xf32> to vector<16x32xf32>
    %228 = arith.mulf %223, %227 : vector<16x32xf32>
    %229 = vector.broadcast %209 : vector<1x32xf32> to vector<16x32xf32>
    %230 = arith.mulf %228, %229 : vector<16x32xf32>
    %231 = vector.broadcast %210 : vector<1x32xf32> to vector<16x32xf32>
    %232 = arith.addf %230, %231 : vector<16x32xf32>
    %233 = vector.shape_cast %232 : vector<16x32xf32> to vector<2x8x32xf32>
    %c0_61 = arith.constant 0 : index
    %c0_62 = arith.constant 0 : index
    %c0_63 = arith.constant 0 : index
    %234 = vector.load %arg8[%c0_61, %c0_62, %c0_63] : memref<2x8x32xf32, #tpu.memory_space<vmem>>, vector<2x8x32xf32>
    tpu.vector_store %arg8[%c0_61, %c0_62, %c0_63], %233 {strides = array<i32>} : memref<2x8x32xf32, #tpu.memory_space<vmem>>, vector<2x8x32xf32>,
    return
  }
  func.func @transform_0(%arg0: i32) -> (i32, i32, i32) {
    %c0_i32 = arith.constant 0 : i32
    %c0_i32_0 = arith.constant 0 : i32
    %c0_i32_1 = arith.constant 0 : i32
    return %arg0, %c0_i32, %c0_i32_0 : i32, i32, i32
  }
  func.func @transform_1(%arg0: i32) -> (i32, i32) {
    %c0_i32 = arith.constant 0 : i32
    %c0_i32_0 = arith.constant 0 : i32
    %c0_i32_1 = arith.constant 0 : i32
    return %c0_i32, %c0_i32_0 : i32, i32
  }
  func.func @transform_2(%arg0: i32) -> (i32, i32) {
    %c0_i32 = arith.constant 0 : i32
    %c0_i32_0 = arith.constant 0 : i32
    %c0_i32_1 = arith.constant 0 : i32
    return %c0_i32, %c0_i32_0 : i32, i32
  }
  func.func @transform_3(%arg0: i32) -> (i32, i32) {
    %c0_i32 = arith.constant 0 : i32
    %c0_i32_0 = arith.constant 0 : i32
    %c0_i32_1 = arith.constant 0 : i32
    return %c0_i32, %c0_i32_0 : i32, i32
  }
  func.func @transform_4(%arg0: i32) -> (i32, i32) {
    %c0_i32 = arith.constant 0 : i32
    %c0_i32_0 = arith.constant 0 : i32
    %c0_i32_1 = arith.constant 0 : i32
    return %c0_i32, %c0_i32_0 : i32, i32
  }
  func.func @transform_5(%arg0: i32) -> (i32, i32) {
    %c0_i32 = arith.constant 0 : i32
    %c0_i32_0 = arith.constant 0 : i32
    %c0_i32_1 = arith.constant 0 : i32
    return %c0_i32, %c0_i32_0 : i32, i32
  }
  func.func @transform_6(%arg0: i32) -> (i32, i32) {
    %c0_i32 = arith.constant 0 : i32
    %c0_i32_0 = arith.constant 0 : i32
    %c0_i32_1 = arith.constant 0 : i32
    return %c0_i32, %c0_i32_0 : i32, i32
  }
  func.func @transform_7(%arg0: i32) -> (i32, i32, i32) {
    %c0_i32 = arith.constant 0 : i32
    %c0_i32_0 = arith.constant 0 : i32
    %c0_i32_1 = arith.constant 0 : i32
    return %arg0, %c0_i32, %c0_i32_0 : i32, i32, i32
  }
}

</mosaic_0001>

<bundles_post_ra>
// kernel: tpu_custom_call.1
= control target key start
LH: loop header
LB: loop body
LE: loop exit
PB: predicated region body
PF: predicated region fallthrough
CT: control target
= control target key end

     0   :  { %12 = vsyncpa [#allocation3], 0  ;;  %s4422_s0 = inlined_call_operand.hbm [shape: f32[2,8,32], index: 0, kind: input, shape index: {}]   ;;  %s4423_s1 = inlined_call_operand.hbm [shape: f32[32,96], index: 1, kind: input, shape index: {}]   ;;  %s4424_s2 = inlined_call_operand.vmem [shape: f32[1,96], index: 2, kind: input, shape index: {}]   ;;  %s4425_s3 = inlined_call_operand.hbm [shape: f32[32,32], index: 3, kind: input, shape index: {}]   ;;  %s4426_s4 = inlined_call_operand.hbm [shape: f32[32,32], index: 4, kind: input, shape index: {}]   ;;  %s4427_s5 = inlined_call_operand.hbm [shape: f32[32,32], index: 5, kind: input, shape index: {}]   ;;  %s4428_s6 = inlined_call_operand.vmem [shape: f32[7,32], index: 6, kind: input, shape index: {}]   ;;  %s4429_s7 = inlined_call_operand.hbm [shape: f32[2,8,32], index: 7, kind: output, shape index: {}]  }
   0x1   :  { %13 = vsyncpa [#allocation6], 0 }
   0x2   :  { %14 = vsyncpa [#allocation9], 0 }
   0x3   :  { %15 = vsyncpa [#allocation4], 0  ;;  %s3915_s24 = smov [#allocation5]   ;;  %s3916_s26 = smov [#allocation8]  }
   0x4   :  { %s33_s25 = sshll.u32 %s3915_s24, 4  ;;  %s59_s27 = sshll.u32 %s3916_s26, 4  ;;  %s34_s25 = int_to_ptr.vmem [resolvable:$true] %s33_s25  ;;  %s3994_s27 = int_to_ptr.vmem [resolvable:$true] %s59_s27 }
   0x5   :  { %s3775_s30 = scalar_lea.hbm %s4423_s1, 512 }
   0x6   :  { %p3776_p0 = scmp.ne.s32.totalorder %s4423_s1, %s3775_s30  ;;  %p3779_p1 = scmp.lt.u32.totalorder %s3775_s30, %s4423_s1 }
   0x8   :  { %p3781_p2 = pnand %p3779_p1, %p3776_p0 }
   0xa   :  { %3784 = shalt.err (!%p3781_p2)
}
   0xb   :  { %s3785_s12 = scalar_lea.vmem %s34_s25, 512  ;;  %p3790_p4 = scmp.lt.s32.totalorder %s34_s25, %s34_s25 }
   0xc   :  { %p3786_p3 = scmp.ne.s32.totalorder %s34_s25, %s3785_s12  ;;  %p3791_p5 = scmp.lt.s32.totalorder %s3785_s12, %s3785_s12 }
   0xe   :  { %p3792_p6 = por %p3791_p5, %p3790_p4 }
  0x10   :  { %p3793_p7 = pnand %p3792_p6, %p3786_p3 }
  0x12   :  { %3796 = shalt.err (!%p3793_p7)
}
  0x13   :  { %s3917_s13 = smov 128   ;;  %s3918_s14 = smov 8  }
  0x14   :  { %39 = dma.hbm_to_vmem [thread:$0]  %s4423_s1, 512, %s34_s25, [#allocation6], %s3917_s13, %s3917_s13, %s3918_s14  }
  0x15   :  { %s3797_s19 = scalar_lea.hbm %s4426_s4, 512 }
  0x16   :  { %p3798_p8 = scmp.ne.s32.totalorder %s4426_s4, %s3797_s19  ;;  %p3801_p9 = scmp.lt.u32.totalorder %s3797_s19, %s4426_s4 }
  0x18   :  { %p3803_p10 = pnand %p3801_p9, %p3798_p8 }
  0x1a   :  { %3806 = shalt.err (!%p3803_p10)
}
  0x1b   :  { %s3807_s24 = scalar_lea.vmem %s3994_s27, 512  ;;  %p3812_p12 = scmp.lt.s32.totalorder %s3994_s27, %s3994_s27 }
  0x1c   :  { %p3808_p11 = scmp.ne.s32.totalorder %s3994_s27, %s3807_s24  ;;  %p3813_p13 = scmp.lt.s32.totalorder %s3807_s24, %s3807_s24 }
  0x1e   :  { %p3814_p0 = por %p3813_p13, %p3812_p12 }
  0x20   :  { %p3815_p1 = pnand %p3814_p0, %p3808_p11 }
  0x22   :  { %3818 = shalt.err (!%p3815_p1)
}
  0x23   :  { %65 = dma.hbm_to_vmem [thread:$0]  %s4426_s4, 512, %s3994_s27, [#allocation9], %s3917_s13, %s3917_s13, %s3918_s14  }
  0x24   :  { %s3919_s26 = smov [#allocation2]   ;;  %s3920_s29 = smov [#allocation7]  }
  0x25   :  { %s21_s28 = sshll.u32 %s3919_s26, 4  ;;  %s47_s30 = sshll.u32 %s3920_s29, 4  ;;  %s22_s28 = int_to_ptr.vmem [resolvable:$true] %s21_s28  ;;  %s4031_s30 = int_to_ptr.vmem [resolvable:$true] %s47_s30 }
  0x26   :  { %s3819_s10 = scalar_lea.hbm %s4422_s0, 256 }
  0x27   :  { %p3820_p2 = scmp.ne.s32.totalorder %s4422_s0, %s3819_s10  ;;  %p3823_p3 = scmp.lt.u32.totalorder %s3819_s10, %s4422_s0 }
  0x29   :  { %p3825_p4 = pnand %p3823_p3, %p3820_p2 }
  0x2b   :  { %3828 = shalt.err (!%p3825_p4)
}
  0x2c   :  { %s3829_s4 = scalar_lea.vmem %s22_s28, 256  ;;  %p3834_p6 = scmp.lt.s32.totalorder %s22_s28, %s22_s28 }
  0x2d   :  { %p3830_p5 = scmp.ne.s32.totalorder %s22_s28, %s3829_s4  ;;  %p3835_p7 = scmp.lt.s32.totalorder %s3829_s4, %s3829_s4 }
  0x2f   :  { %p3836_p8 = por %p3835_p7, %p3834_p6 }
  0x31   :  { %p3837_p9 = pnand %p3836_p8, %p3830_p5 }
  0x33   :  { %3840 = shalt.err (!%p3837_p9)
}
  0x34   :  { %27 = dma.hbm_to_vmem [thread:$0]  %s4422_s0, 256, %s22_s28, [#allocation3], %s3917_s13, %s3917_s13, %s3918_s14  }
  0x35   :  { %s3841_s20 = scalar_lea.hbm %s4425_s3, 512 }
  0x36   :  { %p3842_p10 = scmp.ne.s32.totalorder %s4425_s3, %s3841_s20  ;;  %p3845_p11 = scmp.lt.u32.totalorder %s3841_s20, %s4425_s3 }
  0x38   :  { %p3847_p12 = pnand %p3845_p11, %p3842_p10 }
  0x3a   :  { %3850 = shalt.err (!%p3847_p12)
}
  0x3b   :  { %s3851_s1 = scalar_lea.vmem %s4031_s30, 512  ;;  %p3856_p0 = scmp.lt.s32.totalorder %s4031_s30, %s4031_s30 }
  0x3c   :  { %p3852_p13 = scmp.ne.s32.totalorder %s4031_s30, %s3851_s1  ;;  %p3857_p1 = scmp.lt.s32.totalorder %s3851_s1, %s3851_s1 }
  0x3e   :  { %p3858_p2 = por %p3857_p1, %p3856_p0 }
  0x40   :  { %p3859_p3 = pnand %p3858_p2, %p3852_p13 }
  0x42   :  { %3862 = shalt.err (!%p3859_p3)
}
  0x43   :  { %53 = dma.hbm_to_vmem [thread:$0]  %s4425_s3, 512, %s4031_s30, [#allocation6], %s3917_s13, %s3917_s13, %s3918_s14  }
  0x44   :  { %s3921_s26 = smov [#allocation10]   ;;  %s3863_s9 = scalar_lea.hbm %s4427_s5, 512 }
  0x45   :  { %s71_s28 = sshll.u32 %s3921_s26, 4  ;;  %p3864_p4 = scmp.ne.s32.totalorder %s4427_s5, %s3863_s9  ;;  %s72_s28 = int_to_ptr.vmem [resolvable:$true] %s71_s28 }
  0x46   :  { %p3867_p5 = scmp.lt.u32.totalorder %s3863_s9, %s4427_s5 }
  0x48   :  { %p3869_p6 = pnand %p3867_p5, %p3864_p4 }
  0x4a   :  { %3872 = shalt.err (!%p3869_p6)
}
  0x4b   :  { %s3873_s16 = scalar_lea.vmem %s72_s28, 512  ;;  %p3878_p8 = scmp.lt.s32.totalorder %s72_s28, %s72_s28 }
  0x4c   :  { %p3874_p7 = scmp.ne.s32.totalorder %s72_s28, %s3873_s16  ;;  %p3879_p9 = scmp.lt.s32.totalorder %s3873_s16, %s3873_s16 }
  0x4e   :  { %p3880_p10 = por %p3879_p9, %p3878_p8 }
  0x50   :  { %p3881_p11 = pnand %p3880_p10, %p3874_p7 }
  0x52   :  { %3884 = shalt.err (!%p3881_p11)
}
  0x53   :  { %77 = dma.hbm_to_vmem [thread:$0]  %s4427_s5, 512, %s72_s28, [#allocation9], %s3917_s13, %s3917_s13, %s3918_s14  }
  0x54   :  { %3907 = dma.done.wait [#allocation3], 256  }
  0x55   :  { %3908 = vsyncadd [#allocation3], 4294967040 }
  0x56   :  { %3909 = dma.done.wait [#allocation6], 1024  }
  0x57   :  { %3910 = vsyncadd [#allocation6], 4294966272 }
  0x58   :  { %3911 = dma.done.wait [#allocation9], 1024  }
  0x59   :  { %3912 = vsyncadd [#allocation9], 4294966272  ;;  %vm108_vm0 = vcmask 261120   ;;  %v97_v0 = vld [vmem:[#allocation5] sm:$0xff]  ;;  %v98_v1 = vld [vmem:[#allocation5 + $0x8] sm:$0xff]  ;;  %v3922_v8 = vmov 0.0  }
  0x5a   :  { %v99_v2 = vld [vmem:[#allocation5 + $0x10] sm:$0xff]  ;;  %v3630_v3 = vpack.c.bf16 %v98_v1, %v97_v0  ;;  %v100_v4 = vld [vmem:[#allocation5 + $0x18] sm:$0xff]  ;;  %3437 = vmatprep.subr.mxu1 %v3922_v8  ;;  %vm3923_vm1 = vmmov 0   ;;  %s3924_s27 = smov 96   ;;  %vm195_vm2 = vcmask 31744   ;;  %vm349_vm3 = vcmask 64512  }
  0x5b   :  { %v95_v5 = vld [vmem:[#allocation2] sm:$0xff]  ;;  %v3634_v6 = vpack.c.bf16 %v100_v4, %v99_v2  ;;  %v96_v7 = vld [vmem:[#allocation2 + $0x8] sm:$0xff]  ;;  %3439 = vmatprep.mubr.msk.f32.mxu1 %vm3923_vm1, %v3922_v8  ;;  %s3926_s17 = smov 92   ;;  %s3927_s18 = smov 124   ;;  %vm2894_vm4 = vcmask 97280   ;;  %vm2897_vm5 = vcmask 130048  }
  0x5c   :  { %3434 = vmatprep.mubr.msk.f32.mxu0 %vm108_vm0, %v95_v5  ;;  %3631 = vmatprep.subr.bf16.mxu0 %v3630_v3  ;;  %v3281_v9 = vld [vmem:[%s4424_s2] ss:$0 sm:$0xff]  ;;  %s3925_s2 = smov 64   ;;  %s3928_s19 = smov 60   ;;  %vm2900_vm6 = vcmask 162816   ;;  %vm2906_vm7 = vcmask 228352  }
  0x5d   :  { %3633 = vmatpush3.bf16.msra.mxu0 %v3630_v3  ;;  %s3929_s20 = smov 120   ;;  %s3930_s21 = smov 88   ;;  %vm2903_vm8 = vcmask 195584  }
  0x5e   :  { %3635 = vmatprep.subr.bf16.mxu0 %v3634_v6  ;;  %s3931_s22 = smov 56   ;;  %s3932_s23 = smov 84  }
  0x5f   :  { %s3933_s24 = smov 116   ;;  %s3934_s1 = smov 52  }
  0x60   :  { %s3935_s0 = smov 80   ;;  %s3936_s25 = smov 112  }
  0x61   :  { %3637 = vmatpush3.bf16.msra.mxu0 %v3634_v6  ;;  %s3937_s26 = smov 48   ;;  %s3938_s28 = smov 76  }
  0x62   :  { %3457 = vmatprep.subr.mxu0 %v3922_v8  ;;  %s3939_s29 = smov 108   ;;  %s3940_s8 = smov 44  }
  0x63   :  { %s3941_s9 = smov 72   ;;  %s3942_s10 = smov 104  }
  0x64   :  { %3435 = vmatmul.mubr.msk.f32.vlgmr.msra.gmra.mrb[0].mxu0 %vm108_vm0, %v96_v7  ;;  %s3943_s11 = smov 40   ;;  %s3944_s12 = smov 68  }
  0x65   :  { %3459 = vmatprep.mubr.msk.f32.mxu0 %vm3923_vm1, %v3922_v8  ;;  %s3945_s15 = smov 100   ;;  %s3946_s16 = smov 36  }
  0x66   :  { %s3947_s3 = smov 4   ;;  %s3948_s30 = smov 12  }
  0x67   :  { %s3949_s5 = smov 16   ;;  %s3950_s4 = smov 20  }
 0x137   :  { %v3436_v10 = vpop.f32.mrb[0].mxu0 }
 0x138   :  { %v181_v11 = vpop.f32.mrb[1].mxu0  ;;  %v4097_v13 = vadd.f32 %v3436_v10, %v3281_v9 }
 0x139   :  { %v4094_v12 = vadd.f32 %v3281_v9, %v181_v11 }
 0x13a   :  { %v4111_v17 = vmul.f32 0.5, %v4097_v13 }
 0x13b   :  { %193 = vrot.lane.b32.xlu0 %v4094_v12, %s3924_s27  ;;  %v4103_v15 = vmul.f32 0.5, %v4094_v12 }
 0x13f   :  { %272 = vrot.lane.b32.xlu0 %v4097_v13, %s3924_s27  ;;  %s3951_s27 = smov 24  }
 0x1ad   :  { %v194_v14 = vpop.permute.xlu0 %193 }
 0x1ae   :  { %3438 = vmatpush3.xpose.msk.msra.mxu1 %vm195_vm2, %v194_v14 }
 0x1af   :  { %3442 = vmatprep.subr.mxu1 %v3922_v8 }
 0x1b1   :  { %v273_v16 = vpop.permute.xlu0 %272  ;;  %3440 = vmatmul.mubr.msk.f32.vlgmr.msra.gmra.mrb[0].mxu1 %vm195_vm2, %v4103_v15 }
 0x1b2   :  { %3443 = vmatpush3.xpose.msk.msra.mxu1 %vm195_vm2, %v273_v16  ;;  %3444 = vmatprep.mubr.msk.f32.mxu1 %vm3923_vm1, %v3922_v8 }
 0x1b3   :  { %3447 = vmatprep.subr.mxu1 %v3922_v8 }
 0x1b5   :  { %3445 = vmatmul.mubr.msk.f32.vlgmr.msra.gmra.mrb[2].mxu1 %vm195_vm2, %v4111_v17 }
 0x1b6   :  { %3449 = vmatprep.mubr.msk.f32.mxu1 %vm3923_vm1, %v3922_v8 }
 0x284   :  { %v267_v18 = vpop.f32.mrb[0].mxu1 }
 0x285   :  { %v3441_v19 = vpop.f32.mrb[1].mxu1  ;;  %v350_v20 = vsel %vm349_vm3, %v267_v18, -inf }
 0x286   :  { %351 = vmax.xlane.f32.xlu1 %v350_v20 }
 0x288   :  { %v345_v21 = vpop.f32.mrb[2].mxu1 }
 0x289   :  { %v3446_v22 = vpop.f32.mrb[3].mxu1  ;;  %v353_v23 = vsel %vm349_vm3, %v345_v21, -inf }
 0x28a   :  { %354 = vmax.xlane.f32.xlu1 %v353_v23 }
 0x29b   :  { %372 = vrot.lane.b32.xlu1 %v4094_v12, %s3925_s2 }
 0x29f   :  { %448 = vrot.lane.b32.xlu1 %v4097_v13, %s3925_s2  ;;  %s3952_s2 = smov 28  }
 0x2a3   :  { %526 = vrot.lane.b32.xlu1 %v4094_v12, %s3926_s17 }
 0x2a7   :  { %604 = vrot.lane.b32.xlu1 %v4097_v13, %s3926_s17 }
 0x313   :  { %v352_v24 = vpop.xlane.xlu1 %351 }
 0x314   :  { %v356_v25 = vsub.f32 %v267_v18, %v352_v24 }
 0x316   :  { %v358_v26 = vmul.f32 1.442695, %v356_v25 }
 0x317   :  { %v355_v27 = vpop.xlane.xlu1 %354 }
 0x318   :  { %3701 = vpow2.f32 %v358_v26  ;;  %v357_v28 = vsub.f32 %v345_v21, %v355_v27 }
 0x31a   :  { %v360_v29 = vmul.f32 1.442695, %v357_v28 }
 0x31b   :  { %v373_v30 = vpop.permute.xlu1 %372 }
 0x31c   :  { %3703 = vpow2.f32 %v360_v29  ;;  %3448 = vmatpush3.msra.mxu1 %v373_v30 }
 0x31d   :  { %3452 = vmatprep.subr.mxu1 %v3922_v8 }
 0x31f   :  { %v449_v31 = vpop.permute.xlu1 %448 }
 0x322   :  { %v3702_v32 = vpop.eup %3701 }
 0x323   :  { %v527_v33 = vpop.permute.xlu1 %526  ;;  %v362_v34 = vsel %vm349_vm3, %v3702_v32, 0.0 }
 0x324   :  { %363 = vadd.xlane.f32.xlu0 %v362_v34  ;;  %3458 = vmatpush3.xpose.msk.msra.mxu0 %vm195_vm2, %v527_v33 }
 0x325   :  { %3467 = vmatprep.subr.mxu0 %v3922_v8 }
 0x326   :  { %v3704_v35 = vpop.eup %3703 }
 0x327   :  { %v365_v36 = vsel %vm349_vm3, %v3704_v35, 0.0  ;;  %v605_v37 = vpop.permute.xlu1 %604 }
 0x328   :  { %366 = vadd.xlane.f32.xlu1 %v365_v36 }
 0x339   :  { %602 = vrot.lane.b32.xlu1 %v4111_v17, %s3927_s18 }
 0x33a   :  { %524 = vrot.lane.b32.xlu0 %v4103_v15, %s3927_s18 }
 0x3b1   :  { %v364_v38 = vpop.xlane.xlu0 %363 }
 0x3b2   :  { %3705 = vrcp.f32 %v364_v38 }
 0x3b5   :  { %v525_v39 = vpop.permute.xlu0 %524  ;;  %v367_v40 = vpop.xlane.xlu1 %366 }
 0x3b6   :  { %3707 = vrcp.f32 %v367_v40  ;;  %3460 = vmatmul.mubr.msk.f32.vlgmr.msra.gmra.mrb[2].mxu0 %vm195_vm2, %v525_v39 }
 0x3b7   :  { %3469 = vmatprep.mubr.msk.f32.mxu0 %vm3923_vm1, %v3922_v8 }
 0x3b9   :  { %v603_v45 = vpop.permute.xlu1 %602 }
 0x3bc   :  { %v3706_v41 = vpop.eup %3705 }
 0x3bd   :  { %v370_v42 = vmul.f32 %v3706_v41, %v3702_v32 }
 0x3bf   :  { %3450 = vmatmul.mubr.msk.f32.vlgmr.msra.gmra.mrb[4].mxu1 %vm349_vm3, %v370_v42 }
 0x3c0   :  { %v3708_v43 = vpop.eup %3707  ;;  %3453 = vmatpush3.msra.mxu1 %v449_v31  ;;  %3454 = vmatprep.mubr.msk.f32.mxu1 %vm3923_vm1, %v3922_v8 }
 0x3c1   :  { %v371_v44 = vmul.f32 %v3708_v43, %v3704_v35  ;;  %3462 = vmatprep.subr.mxu1 %v3922_v8 }
 0x3c3   :  { %3455 = vmatmul.mubr.msk.f32.vlgmr.msra.gmra.mrb[6].mxu1 %vm349_vm3, %v371_v44 }
 0x3c4   :  { %3464 = vmatprep.mubr.msk.f32.mxu1 %vm3923_vm1, %v3922_v8 }
 0x3c7   :  { %3463 = vmatpush3.xpose.msk.msra.mxu1 %vm195_vm2, %v605_v37 }
 0x3c8   :  { %3472 = vmatprep.subr.mxu1 %v3922_v8 }
 0x3ca   :  { %3465 = vmatmul.mubr.msk.f32.vlgmr.msra.gmra.mrb[8].mxu1 %vm195_vm2, %v603_v45 }
 0x3cb   :  { %3474 = vmatprep.mubr.msk.f32.mxu1 %vm3923_vm1, %v3922_v8 }
 0x489   :  { %v598_v46 = vpop.f32.mrb[2].mxu0 }
 0x48a   :  { %v3461_v47 = vpop.f32.mrb[3].mxu0  ;;  %v680_v48 = vsel %vm349_vm3, %v598_v46, -inf }
 0x48b   :  { %681 = vmax.xlane.f32.xlu1 %v680_v48 }
 0x492   :  { %v4147_v49 = vpop.f32.mrb[4].mxu1 }
 0x493   :  { %v3451_v50 = vpop.f32.mrb[5].mxu1 }
 0x496   :  { %v4149_v51 = vpop.f32.mrb[6].mxu1 }
 0x497   :  { %v3456_v52 = vpop.f32.mrb[7].mxu1 }
 0x49d   :  { %v676_v53 = vpop.f32.mrb[8].mxu1 }
 0x49e   :  { %v3466_v54 = vpop.f32.mrb[9].mxu1  ;;  %v683_v55 = vsel %vm349_vm3, %v676_v53, -inf }
 0x49f   :  { %684 = vmax.xlane.f32.xlu0 %v683_v55 }
 0x4b5   :  { %778 = vrot.lane.b32.xlu0 %v4097_v13, %s3928_s19 }
 0x4b9   :  { %854 = vrot.lane.b32.xlu0 %v4103_v15, %s3929_s20 }
 0x518   :  { %v682_v56 = vpop.xlane.xlu1 %681 }
 0x519   :  { %v686_v57 = vsub.f32 %v598_v46, %v682_v56 }
 0x51b   :  { %v688_v58 = vmul.f32 1.442695, %v686_v57 }
 0x51d   :  { %3709 = vpow2.f32 %v688_v58 }
 0x527   :  { %v3710_v59 = vpop.eup %3709 }
 0x528   :  { %v692_v60 = vsel %vm349_vm3, %v3710_v59, 0.0 }
 0x529   :  { %693 = vadd.xlane.f32.xlu1 %v692_v60 }
 0x52c   :  { %v685_v61 = vpop.xlane.xlu0 %684 }
 0x52d   :  { %v687_v63 = vsub.f32 %v676_v53, %v685_v61 }
 0x52f   :  { %v690_v0 = vmul.f32 1.442695, %v687_v63 }
 0x530   :  { %v779_v62 = vpop.permute.xlu0 %778 }
 0x531   :  { %3473 = vmatpush3.msra.mxu1 %v779_v62  ;;  %3711 = vpow2.f32 %v690_v0 }
 0x532   :  { %3482 = vmatprep.subr.mxu1 %v3922_v8 }
 0x534   :  { %v855_v9 = vpop.permute.xlu0 %854 }
 0x53a   :  { %702 = vrot.lane.b32.xlu1 %v4094_v12, %s3928_s19 }
 0x53b   :  { %v3712_v1 = vpop.eup %3711 }
 0x53c   :  { %v695_v2 = vsel %vm349_vm3, %v3712_v1, 0.0 }
 0x53e   :  { %856 = vrot.lane.b32.xlu1 %v4094_v12, %s3930_s21 }
 0x542   :  { %934 = vrot.lane.b32.xlu1 %v4097_v13, %s3930_s21 }
 0x566   :  { %696 = vadd.xlane.f32.xlu1 %v695_v2 }
 0x577   :  { %932 = vrot.lane.b32.xlu1 %v4111_v17, %s3929_s20 }
 0x5b6   :  { %v694_v3 = vpop.xlane.xlu1 %693 }
 0x5b7   :  { %3713 = vrcp.f32 %v694_v3 }
 0x5ba   :  { %v703_v4 = vpop.permute.xlu1 %702 }
 0x5bb   :  { %3468 = vmatpush3.msra.mxu0 %v703_v4 }
 0x5bc   :  { %3477 = vmatprep.subr.mxu0 %v3922_v8 }
 0x5be   :  { %v857_v7 = vpop.permute.xlu1 %856 }
 0x5c1   :  { %v3714_v5 = vpop.eup %3713 }
 0x5c2   :  { %v700_v6 = vmul.f32 %v3714_v5, %v3710_v59  ;;  %v935_v10 = vpop.permute.xlu1 %934 }
 0x5c4   :  { %3470 = vmatmul.mubr.msk.f32.vlgmr.msra.gmra.mrb[4].mxu0 %vm349_vm3, %v700_v6 }
 0x5c5   :  { %3478 = vmatpush3.xpose.msk.msra.mxu0 %vm195_vm2, %v857_v7  ;;  %3479 = vmatprep.mubr.msk.f32.mxu0 %vm3923_vm1, %v3922_v8 }
 0x5c6   :  { %3487 = vmatprep.subr.mxu0 %v3922_v8 }
 0x5c8   :  { %3480 = vmatmul.mubr.msk.f32.vlgmr.msra.gmra.mrb[6].mxu0 %vm195_vm2, %v855_v9 }
 0x5c9   :  { %3489 = vmatprep.mubr.msk.f32.mxu0 %vm3923_vm1, %v3922_v8 }
 0x5f3   :  { %v697_v11 = vpop.xlane.xlu1 %696 }
 0x5f4   :  { %3715 = vrcp.f32 %v697_v11 }
 0x5f7   :  { %v933_v18 = vpop.permute.xlu1 %932 }
 0x5fe   :  { %v3716_v14 = vpop.eup %3715 }
 0x5ff   :  { %v701_v16 = vmul.f32 %v3716_v14, %v3712_v1 }
 0x601   :  { %3475 = vmatmul.mubr.msk.f32.vlgmr.msra.gmra.mrb[10].mxu1 %vm349_vm3, %v701_v16 }
 0x602   :  { %3483 = vmatpush3.xpose.msk.msra.mxu1 %vm195_vm2, %v935_v10  ;;  %3484 = vmatprep.mubr.msk.f32.mxu1 %vm3923_vm1, %v3922_v8 }
 0x603   :  { %3492 = vmatprep.subr.mxu1 %v3922_v8 }
 0x605   :  { %3485 = vmatmul.mubr.msk.f32.vlgmr.msra.gmra.mrb[12].mxu1 %vm195_vm2, %v933_v18 }
 0x606   :  { %3494 = vmatprep.mubr.msk.f32.mxu1 %vm3923_vm1, %v3922_v8 }
 0x697   :  { %v4178_v19 = vpop.f32.mrb[4].mxu0 }
 0x698   :  { %v3471_v20 = vpop.f32.mrb[5].mxu0 }
 0x69b   :  { %v928_v21 = vpop.f32.mrb[6].mxu0 }
 0x69c   :  { %v3481_v22 = vpop.f32.mrb[7].mxu0  ;;  %v1010_v23 = vsel %vm349_vm3, %v928_v21, -inf }
 0x69d   :  { %1011 = vmax.xlane.f32.xlu0 %v1010_v23 }
 0x6d4   :  { %v4181_v24 = vpop.f32.mrb[10].mxu1 }
 0x6d5   :  { %v3476_v25 = vpop.f32.mrb[11].mxu1 }
 0x6d8   :  { %v1006_v26 = vpop.f32.mrb[12].mxu1 }
 0x6d9   :  { %v3486_v27 = vpop.f32.mrb[13].mxu1  ;;  %v1013_v28 = vsel %vm349_vm3, %v1006_v26, -inf }
 0x6da   :  { %1014 = vmax.xlane.f32.xlu1 %v1013_v28 }
 0x6eb   :  { %1032 = vrot.lane.b32.xlu1 %v4094_v12, %s3931_s22 }
 0x6ef   :  { %1186 = vrot.lane.b32.xlu1 %v4094_v12, %s3932_s23 }
 0x6f3   :  { %1264 = vrot.lane.b32.xlu1 %v4097_v13, %s3932_s23 }
 0x6f7   :  { %1262 = vrot.lane.b32.xlu1 %v4111_v17, %s3933_s24 }
 0x72a   :  { %v1012_v29 = vpop.xlane.xlu0 %1011 }
 0x72b   :  { %v1016_v30 = vsub.f32 %v928_v21, %v1012_v29 }
 0x72d   :  { %v1018_v31 = vmul.f32 1.442695, %v1016_v30 }
 0x72f   :  { %3717 = vpow2.f32 %v1018_v31 }
 0x739   :  { %v3718_v32 = vpop.eup %3717 }
 0x73a   :  { %v1022_v33 = vsel %vm349_vm3, %v3718_v32, 0.0 }
 0x73b   :  { %1023 = vadd.xlane.f32.xlu0 %v1022_v33 }
 0x751   :  { %1108 = vrot.lane.b32.xlu0 %v4097_v13, %s3931_s22 }
 0x767   :  { %v1015_v34 = vpop.xlane.xlu1 %1014 }
 0x768   :  { %v1017_v35 = vsub.f32 %v1006_v26, %v1015_v34 }
 0x76a   :  { %v1020_v36 = vmul.f32 1.442695, %v1017_v35 }
 0x76b   :  { %v1033_v37 = vpop.permute.xlu1 %1032 }
 0x76c   :  { %3719 = vpow2.f32 %v1020_v36  ;;  %3488 = vmatpush3.msra.mxu0 %v1033_v37 }
 0x76d   :  { %3497 = vmatprep.subr.mxu0 %v3922_v8 }
 0x76f   :  { %v1187_v44 = vpop.permute.xlu1 %1186 }
 0x773   :  { %v1265_v48 = vpop.permute.xlu1 %1264 }
 0x776   :  { %v3720_v38 = vpop.eup %3719 }
 0x777   :  { %v1025_v39 = vsel %vm349_vm3, %v3720_v38, 0.0  ;;  %v1263_v52 = vpop.permute.xlu1 %1262 }
 0x778   :  { %1026 = vadd.xlane.f32.xlu0 %v1025_v39 }
 0x78e   :  { %1184 = vrot.lane.b32.xlu0 %v4103_v15, %s3933_s24 }
 0x7c8   :  { %v1024_v40 = vpop.xlane.xlu0 %1023 }
 0x7c9   :  { %3721 = vrcp.f32 %v1024_v40 }
 0x7cc   :  { %v1109_v41 = vpop.permute.xlu0 %1108 }
 0x7cd   :  { %3493 = vmatpush3.msra.mxu1 %v1109_v41 }
 0x7ce   :  { %3502 = vmatprep.subr.mxu1 %v3922_v8 }
 0x7d3   :  { %v3722_v42 = vpop.eup %3721 }
 0x7d4   :  { %v1030_v43 = vmul.f32 %v3722_v42, %v3718_v32 }
 0x7d6   :  { %3490 = vmatmul.mubr.msk.f32.vlgmr.msra.gmra.mrb[8].mxu0 %vm349_vm3, %v1030_v43 }
 0x7d7   :  { %3498 = vmatpush3.xpose.msk.msra.mxu0 %vm195_vm2, %v1187_v44  ;;  %3499 = vmatprep.mubr.msk.f32.mxu0 %vm3923_vm1, %v3922_v8 }
 0x7d8   :  { %3507 = vmatprep.subr.mxu0 %v3922_v8 }
 0x805   :  { %v1027_v45 = vpop.xlane.xlu0 %1026 }
 0x806   :  { %3723 = vrcp.f32 %v1027_v45 }
 0x809   :  { %v1185_v46 = vpop.permute.xlu0 %1184 }
 0x80a   :  { %3500 = vmatmul.mubr.msk.f32.vlgmr.msra.gmra.mrb[10].mxu0 %vm195_vm2, %v1185_v46 }
 0x80b   :  { %3509 = vmatprep.mubr.msk.f32.mxu0 %vm3923_vm1, %v3922_v8 }
 0x810   :  { %v3724_v47 = vpop.eup %3723 }
 0x811   :  { %v1031_v50 = vmul.f32 %v3724_v47, %v3720_v38 }
 0x813   :  { %3495 = vmatmul.mubr.msk.f32.vlgmr.msra.gmra.mrb[14].mxu1 %vm349_vm3, %v1031_v50 }
 0x814   :  { %3503 = vmatpush3.xpose.msk.msra.mxu1 %vm195_vm2, %v1265_v48  ;;  %3504 = vmatprep.mubr.msk.f32.mxu1 %vm3923_vm1, %v3922_v8 }
 0x815   :  { %3512 = vmatprep.subr.mxu1 %v3922_v8 }
 0x817   :  { %3505 = vmatmul.mubr.msk.f32.vlgmr.msra.gmra.mrb[16].mxu1 %vm195_vm2, %v1263_v52 }
 0x818   :  { %3514 = vmatprep.mubr.msk.f32.mxu1 %vm3923_vm1, %v3922_v8 }
 0x8a9   :  { %v4210_v53 = vpop.f32.mrb[8].mxu0 }
 0x8aa   :  { %v3491_v54 = vpop.f32.mrb[9].mxu0 }
 0x8dd   :  { %v1258_v55 = vpop.f32.mrb[10].mxu0 }
 0x8de   :  { %v3501_v56 = vpop.f32.mrb[11].mxu0  ;;  %v1340_v57 = vsel %vm349_vm3, %v1258_v55, -inf }
 0x8df   :  { %1341 = vmax.xlane.f32.xlu0 %v1340_v57 }
 0x8e6   :  { %v4213_v58 = vpop.f32.mrb[14].mxu1 }
 0x8e7   :  { %v3496_v59 = vpop.f32.mrb[15].mxu1 }
 0x8ea   :  { %v1336_v60 = vpop.f32.mrb[16].mxu1 }
 0x8eb   :  { %v3506_v61 = vpop.f32.mrb[17].mxu1  ;;  %v1343_v62 = vsel %vm349_vm3, %v1336_v60, -inf }
 0x8ec   :  { %1344 = vmax.xlane.f32.xlu1 %v1343_v62 }
 0x8fd   :  { %1362 = vrot.lane.b32.xlu1 %v4094_v12, %s3934_s1 }
 0x901   :  { %1516 = vrot.lane.b32.xlu1 %v4094_v12, %s3935_s0 }
 0x905   :  { %1594 = vrot.lane.b32.xlu1 %v4097_v13, %s3935_s0 }
 0x909   :  { %1592 = vrot.lane.b32.xlu1 %v4111_v17, %s3936_s25 }
 0x96c   :  { %v1342_v63 = vpop.xlane.xlu0 %1341 }
 0x96d   :  { %v1346_v0 = vsub.f32 %v1258_v55, %v1342_v63 }
 0x96f   :  { %v1348_v1 = vmul.f32 1.442695, %v1346_v0 }
 0x971   :  { %3725 = vpow2.f32 %v1348_v1 }
 0x979   :  { %v1345_v2 = vpop.xlane.xlu1 %1344 }
 0x97a   :  { %v1347_v6 = vsub.f32 %v1336_v60, %v1345_v2 }
 0x97b   :  { %v3726_v3 = vpop.eup %3725 }
 0x97c   :  { %v1352_v4 = vsel %vm349_vm3, %v3726_v3, 0.0  ;;  %v1350_v7 = vmul.f32 1.442695, %v1347_v6 }
 0x97d   :  { %1353 = vadd.xlane.f32.xlu0 %v1352_v4  ;;  %v1363_v5 = vpop.permute.xlu1 %1362 }
 0x97e   :  { %3508 = vmatpush3.msra.mxu0 %v1363_v5  ;;  %3727 = vpow2.f32 %v1350_v7 }
 0x97f   :  { %3517 = vmatprep.subr.mxu0 %v3922_v8 }
 0x981   :  { %v1517_v20 = vpop.permute.xlu1 %1516 }
 0x985   :  { %v1595_v25 = vpop.permute.xlu1 %1594 }
 0x988   :  { %v3728_v9 = vpop.eup %3727 }
 0x989   :  { %v1355_v10 = vsel %vm349_vm3, %v3728_v9, 0.0  ;;  %v1593_v27 = vpop.permute.xlu1 %1592 }
 0x993   :  { %1438 = vrot.lane.b32.xlu0 %v4097_v13, %s3934_s1 }
 0x9b2   :  { %1356 = vadd.xlane.f32.xlu0 %v1355_v10 }
 0x9c8   :  { %1514 = vrot.lane.b32.xlu0 %v4103_v15, %s3936_s25 }
 0xa0a   :  { %v1354_v11 = vpop.xlane.xlu0 %1353 }
 0xa0b   :  { %3729 = vrcp.f32 %v1354_v11 }
 0xa0e   :  { %v1439_v14 = vpop.permute.xlu0 %1438 }
 0xa0f   :  { %3513 = vmatpush3.msra.mxu1 %v1439_v14 }
 0xa10   :  { %3522 = vmatprep.subr.mxu1 %v3922_v8 }
 0xa15   :  { %v3730_v16 = vpop.eup %3729 }
 0xa16   :  { %v1360_v18 = vmul.f32 %v3730_v16, %v3726_v3 }
 0xa18   :  { %3510 = vmatmul.mubr.msk.f32.vlgmr.msra.gmra.mrb[12].mxu0 %vm349_vm3, %v1360_v18 }
 0xa19   :  { %3518 = vmatpush3.xpose.msk.msra.mxu0 %vm195_vm2, %v1517_v20  ;;  %3519 = vmatprep.mubr.msk.f32.mxu0 %vm3923_vm1, %v3922_v8 }
 0xa1a   :  { %3527 = vmatprep.subr.mxu0 %v3922_v8 }
 0xa3f   :  { %v1357_v21 = vpop.xlane.xlu0 %1356 }
 0xa40   :  { %3731 = vrcp.f32 %v1357_v21 }
 0xa43   :  { %v1515_v22 = vpop.permute.xlu0 %1514 }
 0xa44   :  { %3520 = vmatmul.mubr.msk.f32.vlgmr.msra.gmra.mrb[14].mxu0 %vm195_vm2, %v1515_v22 }
 0xa45   :  { %3529 = vmatprep.mubr.msk.f32.mxu0 %vm3923_vm1, %v3922_v8 }
 0xa4a   :  { %v3732_v23 = vpop.eup %3731 }
 0xa4b   :  { %v1361_v26 = vmul.f32 %v3732_v23, %v3728_v9 }
 0xa4d   :  { %3515 = vmatmul.mubr.msk.f32.vlgmr.msra.gmra.mrb[18].mxu1 %vm349_vm3, %v1361_v26 }
 0xa4e   :  { %3523 = vmatpush3.xpose.msk.msra.mxu1 %vm195_vm2, %v1595_v25  ;;  %3524 = vmatprep.mubr.msk.f32.mxu1 %vm3923_vm1, %v3922_v8 }
 0xa4f   :  { %3532 = vmatprep.subr.mxu1 %v3922_v8 }
 0xa51   :  { %3525 = vmatmul.mubr.msk.f32.vlgmr.msra.gmra.mrb[20].mxu1 %vm195_vm2, %v1593_v27 }
 0xa52   :  { %3534 = vmatprep.mubr.msk.f32.mxu1 %vm3923_vm1, %v3922_v8 }
 0xaeb   :  { %v4242_v28 = vpop.f32.mrb[12].mxu0 }
 0xaec   :  { %v3511_v29 = vpop.f32.mrb[13].mxu0 }
 0xb17   :  { %v1588_v30 = vpop.f32.mrb[14].mxu0 }
 0xb18   :  { %v3521_v31 = vpop.f32.mrb[15].mxu0  ;;  %v1670_v32 = vsel %vm349_vm3, %v1588_v30, -inf }
 0xb19   :  { %1671 = vmax.xlane.f32.xlu0 %v1670_v32 }
 0xb20   :  { %v4245_v33 = vpop.f32.mrb[18].mxu1 }
 0xb21   :  { %v3516_v34 = vpop.f32.mrb[19].mxu1 }
 0xb24   :  { %v1666_v35 = vpop.f32.mrb[20].mxu1 }
 0xb25   :  { %v3526_v36 = vpop.f32.mrb[21].mxu1  ;;  %v1673_v37 = vsel %vm349_vm3, %v1666_v35, -inf }
 0xb26   :  { %1674 = vmax.xlane.f32.xlu1 %v1673_v37 }
 0xb37   :  { %1692 = vrot.lane.b32.xlu1 %v4094_v12, %s3937_s26 }
 0xb3b   :  { %1846 = vrot.lane.b32.xlu1 %v4094_v12, %s3938_s28 }
 0xb3f   :  { %1924 = vrot.lane.b32.xlu1 %v4097_v13, %s3938_s28 }
 0xb43   :  { %1922 = vrot.lane.b32.xlu1 %v4111_v17, %s3939_s29 }
 0xba6   :  { %v1672_v38 = vpop.xlane.xlu0 %1671 }
 0xba7   :  { %v1676_v39 = vsub.f32 %v1588_v30, %v1672_v38 }
 0xba9   :  { %v1678_v40 = vmul.f32 1.442695, %v1676_v39 }
 0xbab   :  { %3733 = vpow2.f32 %v1678_v40 }
 0xbb3   :  { %v1675_v41 = vpop.xlane.xlu1 %1674 }
 0xbb4   :  { %v1677_v45 = vsub.f32 %v1666_v35, %v1675_v41 }
 0xbb5   :  { %v3734_v42 = vpop.eup %3733 }
 0xbb6   :  { %v1682_v43 = vsel %vm349_vm3, %v3734_v42, 0.0  ;;  %v1680_v46 = vmul.f32 1.442695, %v1677_v45 }
 0xbb7   :  { %1683 = vadd.xlane.f32.xlu0 %v1682_v43  ;;  %v1693_v44 = vpop.permute.xlu1 %1692 }
 0xbb8   :  { %3528 = vmatpush3.msra.mxu0 %v1693_v44  ;;  %3735 = vpow2.f32 %v1680_v46 }
 0xbb9   :  { %3537 = vmatprep.subr.mxu0 %v3922_v8 }
 0xbbb   :  { %v1847_v56 = vpop.permute.xlu1 %1846 }
 0xbbf   :  { %v1925_v61 = vpop.permute.xlu1 %1924 }
 0xbc2   :  { %v3736_v47 = vpop.eup %3735 }
 0xbc3   :  { %v1685_v48 = vsel %vm349_vm3, %v3736_v47, 0.0  ;;  %v1923_v63 = vpop.permute.xlu1 %1922 }
 0xbcd   :  { %1768 = vrot.lane.b32.xlu0 %v4097_v13, %s3937_s26 }
 0xbec   :  { %1686 = vadd.xlane.f32.xlu0 %v1685_v48 }
 0xc02   :  { %1844 = vrot.lane.b32.xlu0 %v4103_v15, %s3939_s29 }
 0xc44   :  { %v1684_v50 = vpop.xlane.xlu0 %1683 }
 0xc45   :  { %3737 = vrcp.f32 %v1684_v50 }
 0xc48   :  { %v1769_v52 = vpop.permute.xlu0 %1768 }
 0xc49   :  { %3533 = vmatpush3.msra.mxu1 %v1769_v52 }
 0xc4a   :  { %3542 = vmatprep.subr.mxu1 %v3922_v8 }
 0xc4f   :  { %v3738_v54 = vpop.eup %3737 }
 0xc50   :  { %v1690_v55 = vmul.f32 %v3738_v54, %v3734_v42 }
 0xc52   :  { %3530 = vmatmul.mubr.msk.f32.vlgmr.msra.gmra.mrb[16].mxu0 %vm349_vm3, %v1690_v55 }
 0xc53   :  { %3538 = vmatpush3.xpose.msk.msra.mxu0 %vm195_vm2, %v1847_v56  ;;  %3539 = vmatprep.mubr.msk.f32.mxu0 %vm3923_vm1, %v3922_v8 }
 0xc54   :  { %3547 = vmatprep.subr.mxu0 %v3922_v8 }
 0xc79   :  { %v1687_v57 = vpop.xlane.xlu0 %1686 }
 0xc7a   :  { %3739 = vrcp.f32 %v1687_v57 }
 0xc7d   :  { %v1845_v59 = vpop.permute.xlu0 %1844 }
 0xc7e   :  { %3540 = vmatmul.mubr.msk.f32.vlgmr.msra.gmra.mrb[18].mxu0 %vm195_vm2, %v1845_v59 }
 0xc7f   :  { %3549 = vmatprep.mubr.msk.f32.mxu0 %vm3923_vm1, %v3922_v8 }
 0xc84   :  { %v3740_v60 = vpop.eup %3739 }
 0xc85   :  { %v1691_v62 = vmul.f32 %v3740_v60, %v3736_v47 }
 0xc87   :  { %3535 = vmatmul.mubr.msk.f32.vlgmr.msra.gmra.mrb[22].mxu1 %vm349_vm3, %v1691_v62 }
 0xc88   :  { %3543 = vmatpush3.xpose.msk.msra.mxu1 %vm195_vm2, %v1925_v61  ;;  %3544 = vmatprep.mubr.msk.f32.mxu1 %vm3923_vm1, %v3922_v8 }
 0xc89   :  { %3552 = vmatprep.subr.mxu1 %v3922_v8 }
 0xc8b   :  { %3545 = vmatmul.mubr.msk.f32.vlgmr.msra.gmra.mrb[24].mxu1 %vm195_vm2, %v1923_v63 }
 0xc8c   :  { %3554 = vmatprep.mubr.msk.f32.mxu1 %vm3923_vm1, %v3922_v8 }
 0xd25   :  { %v4274_v0 = vpop.f32.mrb[16].mxu0 }
 0xd26   :  { %v3531_v1 = vpop.f32.mrb[17].mxu0 }
 0xd51   :  { %v1918_v2 = vpop.f32.mrb[18].mxu0 }
 0xd52   :  { %v3541_v3 = vpop.f32.mrb[19].mxu0  ;;  %v2000_v4 = vsel %vm349_vm3, %v1918_v2, -inf }
 0xd53   :  { %2001 = vmax.xlane.f32.xlu0 %v2000_v4 }
 0xd5a   :  { %v4277_v5 = vpop.f32.mrb[22].mxu1 }
 0xd5b   :  { %v3536_v6 = vpop.f32.mrb[23].mxu1 }
 0xd5e   :  { %v1996_v7 = vpop.f32.mrb[24].mxu1 }
 0xd5f   :  { %v3546_v9 = vpop.f32.mrb[25].mxu1  ;;  %v2003_v10 = vsel %vm349_vm3, %v1996_v7, -inf }
 0xd60   :  { %2004 = vmax.xlane.f32.xlu1 %v2003_v10 }
 0xd71   :  { %2022 = vrot.lane.b32.xlu1 %v4094_v12, %s3940_s8 }
 0xd75   :  { %2176 = vrot.lane.b32.xlu1 %v4094_v12, %s3941_s9 }
 0xd79   :  { %2254 = vrot.lane.b32.xlu1 %v4097_v13, %s3941_s9 }
 0xd7d   :  { %2252 = vrot.lane.b32.xlu1 %v4111_v17, %s3942_s10 }
 0xde0   :  { %v2002_v11 = vpop.xlane.xlu0 %2001 }
 0xde1   :  { %v2006_v14 = vsub.f32 %v1918_v2, %v2002_v11 }
 0xde3   :  { %v2008_v16 = vmul.f32 1.442695, %v2006_v14 }
 0xde5   :  { %3741 = vpow2.f32 %v2008_v16 }
 0xded   :  { %v2005_v18 = vpop.xlane.xlu1 %2004 }
 0xdee   :  { %v2007_v23 = vsub.f32 %v1996_v7, %v2005_v18 }
 0xdef   :  { %v3742_v20 = vpop.eup %3741 }
 0xdf0   :  { %v2012_v21 = vsel %vm349_vm3, %v3742_v20, 0.0  ;;  %v2010_v25 = vmul.f32 1.442695, %v2007_v23 }
 0xdf1   :  { %2013 = vadd.xlane.f32.xlu0 %v2012_v21  ;;  %v2023_v22 = vpop.permute.xlu1 %2022 }
 0xdf2   :  { %3548 = vmatpush3.msra.mxu0 %v2023_v22  ;;  %3743 = vpow2.f32 %v2010_v25 }
 0xdf3   :  { %3557 = vmatprep.subr.mxu0 %v3922_v8 }
 0xdf5   :  { %v2177_v34 = vpop.permute.xlu1 %2176 }
 0xdf9   :  { %v2255_v38 = vpop.permute.xlu1 %2254 }
 0xdfc   :  { %v3744_v26 = vpop.eup %3743 }
 0xdfd   :  { %v2015_v27 = vsel %vm349_vm3, %v3744_v26, 0.0  ;;  %v2253_v40 = vpop.permute.xlu1 %2252 }
 0xe07   :  { %2098 = vrot.lane.b32.xlu0 %v4097_v13, %s3940_s8 }
 0xe26   :  { %2016 = vadd.xlane.f32.xlu0 %v2015_v27 }
 0xe3c   :  { %2174 = vrot.lane.b32.xlu0 %v4103_v15, %s3942_s10 }
 0xe7e   :  { %v2014_v29 = vpop.xlane.xlu0 %2013 }
 0xe7f   :  { %3745 = vrcp.f32 %v2014_v29 }
 0xe82   :  { %v2099_v30 = vpop.permute.xlu0 %2098 }
 0xe83   :  { %3553 = vmatpush3.msra.mxu1 %v2099_v30 }
 0xe84   :  { %3562 = vmatprep.subr.mxu1 %v3922_v8 }
 0xe89   :  { %v3746_v31 = vpop.eup %3745 }
 0xe8a   :  { %v2020_v32 = vmul.f32 %v3746_v31, %v3742_v20 }
 0xe8c   :  { %3550 = vmatmul.mubr.msk.f32.vlgmr.msra.gmra.mrb[20].mxu0 %vm349_vm3, %v2020_v32 }
 0xe8d   :  { %3558 = vmatpush3.xpose.msk.msra.mxu0 %vm195_vm2, %v2177_v34  ;;  %3559 = vmatprep.mubr.msk.f32.mxu0 %vm3923_vm1, %v3922_v8 }
 0xe8e   :  { %3567 = vmatprep.subr.mxu0 %v3922_v8 }
 0xeb3   :  { %v2017_v35 = vpop.xlane.xlu0 %2016 }
 0xeb4   :  { %3747 = vrcp.f32 %v2017_v35 }
 0xeb7   :  { %v2175_v36 = vpop.permute.xlu0 %2174 }
 0xeb8   :  { %3560 = vmatmul.mubr.msk.f32.vlgmr.msra.gmra.mrb[22].mxu0 %vm195_vm2, %v2175_v36 }
 0xeb9   :  { %3569 = vmatprep.mubr.msk.f32.mxu0 %vm3923_vm1, %v3922_v8 }
 0xebe   :  { %v3748_v37 = vpop.eup %3747 }
 0xebf   :  { %v2021_v39 = vmul.f32 %v3748_v37, %v3744_v26 }
 0xec1   :  { %3555 = vmatmul.mubr.msk.f32.vlgmr.msra.gmra.mrb[26].mxu1 %vm349_vm3, %v2021_v39 }
 0xec2   :  { %3563 = vmatpush3.xpose.msk.msra.mxu1 %vm195_vm2, %v2255_v38  ;;  %3564 = vmatprep.mubr.msk.f32.mxu1 %vm3923_vm1, %v3922_v8 }
 0xec3   :  { %3572 = vmatprep.subr.mxu1 %v3922_v8 }
 0xec5   :  { %3565 = vmatmul.mubr.msk.f32.vlgmr.msra.gmra.mrb[28].mxu1 %vm195_vm2, %v2253_v40 }
 0xec6   :  { %3574 = vmatprep.mubr.msk.f32.mxu1 %vm3923_vm1, %v3922_v8 }
 0xf5f   :  { %v4306_v41 = vpop.f32.mrb[20].mxu0 }
 0xf60   :  { %v3551_v42 = vpop.f32.mrb[21].mxu0 }
 0xf8b   :  { %v2248_v43 = vpop.f32.mrb[22].mxu0 }
 0xf8c   :  { %v3561_v44 = vpop.f32.mrb[23].mxu0  ;;  %v2330_v45 = vsel %vm349_vm3, %v2248_v43, -inf }
 0xf8d   :  { %2331 = vmax.xlane.f32.xlu0 %v2330_v45 }
 0xf94   :  { %v4309_v46 = vpop.f32.mrb[26].mxu1 }
 0xf95   :  { %v3556_v47 = vpop.f32.mrb[27].mxu1 }
 0xf98   :  { %v2326_v48 = vpop.f32.mrb[28].mxu1 }
 0xf99   :  { %v3566_v50 = vpop.f32.mrb[29].mxu1  ;;  %v2333_v52 = vsel %vm349_vm3, %v2326_v48, -inf }
 0xf9a   :  { %2334 = vmax.xlane.f32.xlu1 %v2333_v52 }
 0xfab   :  { %2352 = vrot.lane.b32.xlu1 %v4094_v12, %s3943_s11 }
 0xfaf   :  { %2506 = vrot.lane.b32.xlu1 %v4094_v12, %s3944_s12 }
 0xfb3   :  { %2584 = vrot.lane.b32.xlu1 %v4097_v13, %s3944_s12 }
 0xfb7   :  { %2582 = vrot.lane.b32.xlu1 %v4111_v17, %s3945_s15 }
0x101a   :  { %v2332_v54 = vpop.xlane.xlu0 %2331 }
0x101b   :  { %v2336_v55 = vsub.f32 %v2248_v43, %v2332_v54 }
0x101d   :  { %v2338_v56 = vmul.f32 1.442695, %v2336_v55 }
0x101f   :  { %3749 = vpow2.f32 %v2338_v56 }
0x1027   :  { %v2335_v57 = vpop.xlane.xlu1 %2334 }
0x1028   :  { %v2337_v62 = vsub.f32 %v2326_v48, %v2335_v57 }
0x1029   :  { %v3750_v59 = vpop.eup %3749 }
0x102a   :  { %v2342_v60 = vsel %vm349_vm3, %v3750_v59, 0.0  ;;  %v2340_v63 = vmul.f32 1.442695, %v2337_v62 }
0x102b   :  { %2343 = vadd.xlane.f32.xlu0 %v2342_v60  ;;  %v2353_v61 = vpop.permute.xlu1 %2352 }
0x102c   :  { %3568 = vmatpush3.msra.mxu0 %v2353_v61  ;;  %3751 = vpow2.f32 %v2340_v63 }
0x102d   :  { %3577 = vmatprep.subr.mxu0 %v3922_v8 }
0x102f   :  { %v2507_v7 = vpop.permute.xlu1 %2506 }
0x1033   :  { %v2585_v11 = vpop.permute.xlu1 %2584 }
0x1036   :  { %v3752_v1 = vpop.eup %3751 }
0x1037   :  { %v2345_v17 = vsel %vm349_vm3, %v3752_v1, 0.0  ;;  %v2583_v16 = vpop.permute.xlu1 %2582 }
0x1041   :  { %2428 = vrot.lane.b32.xlu0 %v4097_v13, %s3943_s11 }
0x1060   :  { %2346 = vadd.xlane.f32.xlu0 %v2345_v17 }
0x1076   :  { %2504 = vrot.lane.b32.xlu0 %v4103_v15, %s3945_s15 }
0x10b8   :  { %v2344_v2 = vpop.xlane.xlu0 %2343 }
0x10b9   :  { %3753 = vrcp.f32 %v2344_v2 }
0x10bc   :  { %v2429_v3 = vpop.permute.xlu0 %2428 }
0x10bd   :  { %3573 = vmatpush3.msra.mxu1 %v2429_v3 }
0x10be   :  { %3582 = vmatprep.subr.mxu1 %v3922_v8 }
0x10c3   :  { %v3754_v4 = vpop.eup %3753 }
0x10c4   :  { %v2350_v6 = vmul.f32 %v3754_v4, %v3750_v59 }
0x10c6   :  { %3570 = vmatmul.mubr.msk.f32.vlgmr.msra.gmra.mrb[24].mxu0 %vm349_vm3, %v2350_v6 }
0x10c7   :  { %3578 = vmatpush3.xpose.msk.msra.mxu0 %vm195_vm2, %v2507_v7  ;;  %3579 = vmatprep.mubr.msk.f32.mxu0 %vm3923_vm1, %v3922_v8 }
0x10c8   :  { %3587 = vmatprep.subr.mxu0 %v3922_v8 }
0x10ed   :  { %v2347_v9 = vpop.xlane.xlu0 %2346 }
0x10ee   :  { %3755 = vrcp.f32 %v2347_v9 }
0x10f1   :  { %v2505_v15 = vpop.permute.xlu0 %2504 }
0x10f2   :  { %3580 = vmatmul.mubr.msk.f32.vlgmr.msra.gmra.mrb[26].mxu0 %vm195_vm2, %v2505_v15 }
0x10f3   :  { %3589 = vmatprep.mubr.msk.f32.mxu0 %vm3923_vm1, %v3922_v8 }
0x10f8   :  { %v3756_v10 = vpop.eup %3755 }
0x10f9   :  { %v2351_v14 = vmul.f32 %v3756_v10, %v3752_v1 }
0x10fb   :  { %3575 = vmatmul.mubr.msk.f32.vlgmr.msra.gmra.mrb[30].mxu1 %vm349_vm3, %v2351_v14 }
0x10fc   :  { %3583 = vmatpush3.xpose.msk.msra.mxu1 %vm195_vm2, %v2585_v11  ;;  %3584 = vmatprep.mubr.msk.f32.mxu1 %vm3923_vm1, %v3922_v8 }
0x10fd   :  { %3592 = vmatprep.subr.mxu1 %v3922_v8 }
0x10ff   :  { %3585 = vmatmul.mubr.msk.f32.vlgmr.msra.gmra.mrb[32].mxu1 %vm195_vm2, %v2583_v16 }
0x1100   :  { %3594 = vmatprep.mubr.msk.f32.mxu1 %vm3923_vm1, %v3922_v8 }
0x1199   :  { %v2424_v18 = vpop.f32.mrb[24].mxu0 }
0x119a   :  { %v3571_v20 = vpop.f32.mrb[25].mxu0 }
0x11c5   :  { %v2578_v21 = vpop.f32.mrb[26].mxu0 }
0x11c6   :  { %v3581_v22 = vpop.f32.mrb[27].mxu0  ;;  %v2660_v23 = vsel %vm349_vm3, %v2578_v21, -inf }
0x11c7   :  { %2661 = vmax.xlane.f32.xlu0 %v2660_v23  ;;  %v2914_v22 = vlaneseq }
0x11c9   :  { %v4372_v23 = vshrl.u32 %v2914_v22, 7 }
0x11ce   :  { %v2500_v25 = vpop.f32.mrb[30].mxu1 }
0x11cf   :  { %v3576_v26 = vpop.f32.mrb[31].mxu1 }
0x11d2   :  { %v2656_v27 = vpop.f32.mrb[32].mxu1 }
0x11d3   :  { %v3586_v29 = vpop.f32.mrb[33].mxu1  ;;  %v2663_v30 = vsel %vm349_vm3, %v2656_v27, -inf }
0x11d4   :  { %2664 = vmax.xlane.f32.xlu1 %v2663_v30 }
0x11e5   :  { %2682 = vrot.lane.b32.xlu1 %v4094_v12, %s3946_s16 }
0x11e9   :  { %2836 = vrot.lane.b32.xlu1 %v4178_v19, %s3947_s3 }
0x11ed   :  { %2838 = vrot.lane.b32.xlu1 %v4181_v24, %s3947_s3 }
0x11f1   :  { %2846 = vrot.lane.b32.xlu1 %v4213_v58, %s3918_s14 }
0x11f5   :  { %2854 = vrot.lane.b32.xlu1 %v4245_v33, %s3948_s30 }
0x11f9   :  { %2862 = vrot.lane.b32.xlu1 %v4277_v5, %s3949_s5 }
0x11fd   :  { %2870 = vrot.lane.b32.xlu1 %v4309_v46, %s3950_s4 }
0x1201   :  { %2878 = vrot.lane.b32.xlu1 %v2500_v25, %s3951_s27  ;;  %v2916_v25 = vsub.s32 0, %v4372_v23 }
0x1254   :  { %v2662_v8 = vpop.xlane.xlu0 %2661 }
0x1255   :  { %v2666_v12 = vsub.f32 %v2578_v21, %v2662_v8 }
0x1257   :  { %v2668_v31 = vmul.f32 1.442695, %v2666_v12  ;;  %v3773_v12 = vld [vmem:[#allocation2 + $0x8] sm:$0xff] }
0x1259   :  { %3757 = vpow2.f32 %v2668_v31 }
0x1261   :  { %v2665_v19 = vpop.xlane.xlu1 %2664 }
0x1262   :  { %v2667_v24 = vsub.f32 %v2656_v27, %v2665_v19  ;;  %v3774_v19 = vld [vmem:[#allocation2] sm:$0xff] }
0x1263   :  { %v3758_v32 = vpop.eup %3757 }
0x1264   :  { %v2670_v34 = vmul.f32 1.442695, %v2667_v24  ;;  %v2672_v58 = vsel %vm349_vm3, %v3758_v32, 0.0 }
0x1265   :  { %2673 = vadd.xlane.f32.xlu0 %v2672_v58  ;;  %v2683_v33 = vpop.permute.xlu1 %2682 }
0x1266   :  { %3759 = vpow2.f32 %v2670_v34  ;;  %3588 = vmatpush3.msra.mxu0 %v2683_v33 }
0x1269   :  { %v2837_v52 = vpop.permute.xlu1 %2836 }
0x126a   :  { %v2890_v61 = vsel %vm195_vm2, %v4147_v49, %v2837_v52 }
0x126d   :  { %v2839_v55 = vpop.permute.xlu1 %2838 }
0x126e   :  { %v2891_v9 = vsel %vm195_vm2, %v4149_v51, %v2839_v55  ;;  %v4378_v51 = vld [vmem:[%s4428_s6] sm:$0x7f]  ;;  %s3953_s6 = smov [#allocation11]  }
0x126f   :  { %v2917_v26 = vrot.slane %v4378_v51, %v2916_v25  ;;  %s3267_s19 = sshll.u32 %s3953_s6, 4  ;;  %s3268_s19 = int_to_ptr.vmem [resolvable:$true] %s3267_s19 }
0x1270   :  { %v3760_v5 = vpop.eup %3759  ;;  %s3885_s20 = scalar_lea.vmem %s3268_s19, 256  ;;  %p3890_p13 = scmp.lt.s32.totalorder %s3268_s19, %s3268_s19 }
0x1271   :  { %v2675_v35 = vsel %vm349_vm3, %v3760_v5, 0.0  ;;  %v2847_v57 = vpop.permute.xlu1 %2846  ;;  %p3886_p12 = scmp.ne.s32.totalorder %s3268_s19, %s3885_s20  ;;  %p3891_p0 = scmp.lt.s32.totalorder %s3885_s20, %s3885_s20 }
0x1272   :  { %2676 = vadd.xlane.f32.xlu0 %v2675_v35  ;;  %v2893_v15 = vsel %vm349_vm3, %v2891_v9, %v2847_v57  ;;  %v3036_v57 = vsub.s32 4, %v4372_v23  ;;  %v3046_v9 = vsub.s32 1, %v4372_v23 }
0x1273   :  { %p3892_p1 = por %p3891_p0, %p3890_p13 }
0x1275   :  { %v2855_v60 = vpop.permute.xlu1 %2854  ;;  %p3893_p2 = pnand %p3892_p1, %p3886_p12 }
0x1276   :  { %v2896_v11 = vsel %vm2894_vm4, %v2893_v15, %v2855_v60  ;;  %v3047_v15 = vrot.slane %v4378_v51, %v3046_v9 }
0x1279   :  { %v2863_v1 = vpop.permute.xlu1 %2862 }
0x127a   :  { %v2899_v14 = vsel %vm2897_vm5, %v2896_v11, %v2863_v1 }
0x127d   :  { %v2871_v49 = vpop.permute.xlu1 %2870 }
0x127e   :  { %v2902_v16 = vsel %vm2900_vm6, %v2899_v14, %v2871_v49 }
0x1281   :  { %v2879_v10 = vpop.permute.xlu1 %2878 }
0x1288   :  { %2758 = vrot.lane.b32.xlu0 %v4097_v13, %s3946_s16 }
0x128c   :  { %2844 = vrot.lane.b32.xlu0 %v4210_v53, %s3918_s14  ;;  %v2910_v53 = vld [vmem:[#allocation7] sm:$0xff] }
0x1290   :  { %2852 = vrot.lane.b32.xlu0 %v4242_v28, %s3948_s30  ;;  %v2911_v28 = vld [vmem:[#allocation7 + $0x8] sm:$0xff] }
0x1291   :  { %v3638_v43 = vpack.c.bf16 %v2911_v28, %v2910_v53  ;;  %v3041_v53 = vld [vmem:[#allocation8 + $0x8] sm:$0xff] }
0x1293   :  { %3639 = vmatprep.subr.bf16.mxu0 %v3638_v43 }
0x1294   :  { %2860 = vrot.lane.b32.xlu0 %v4274_v0, %s3949_s5  ;;  %v2912_v0 = vld [vmem:[#allocation7 + $0x10] sm:$0xff] }
0x1298   :  { %2868 = vrot.lane.b32.xlu0 %v4306_v41, %s3950_s4  ;;  %v2913_v41 = vld [vmem:[#allocation7 + $0x18] sm:$0xff] }
0x1299   :  { %v3642_v44 = vpack.c.bf16 %v2913_v41, %v2912_v0  ;;  %v3042_v0 = vld [vmem:[#allocation8 + $0x10] sm:$0xff] }
0x129c   :  { %2876 = vrot.lane.b32.xlu0 %v2424_v18, %s3951_s27  ;;  %v2905_v18 = vsel %vm2903_vm8, %v2902_v16, %v2879_v10 }
0x12f2   :  { %v2674_v36 = vpop.xlane.xlu0 %2673 }
0x12f3   :  { %3761 = vrcp.f32 %v2674_v36 }
0x12fd   :  { %v3762_v37 = vpop.eup %3761 }
0x12fe   :  { %v2680_v38 = vmul.f32 %v3762_v37, %v3758_v32 }
0x12ff   :  { %v2677_v39 = vpop.xlane.xlu0 %2676 }
0x1300   :  { %3763 = vrcp.f32 %v2677_v39  ;;  %3590 = vmatmul.mubr.msk.f32.vlgmr.msra.gmra.mrb[28].mxu0 %vm349_vm3, %v2680_v38 }
0x1301   :  { %3641 = vmatpush3.bf16.msra.mxu0 %v3638_v43  ;;  %v3043_v43 = vld [vmem:[#allocation8 + $0x18] sm:$0xff] }
0x1302   :  { %3643 = vmatprep.subr.bf16.mxu0 %v3642_v44  ;;  %v3650_v41 = vpack.c.bf16 %v3043_v43, %v3042_v0  ;;  %v3256_v0 = vsub.s32 6, %v4372_v23 }
0x1303   :  { %v2759_v40 = vpop.permute.xlu0 %2758 }
0x1304   :  { %3593 = vmatpush3.msra.mxu1 %v2759_v40 }
0x1305   :  { %3645 = vmatpush3.bf16.msra.mxu0 %v3642_v44  ;;  %v3131_v44 = vld [vmem:[#allocation10] sm:$0xff] }
0x1307   :  { %v2845_v50 = vpop.permute.xlu0 %2844 }
0x1308   :  { %v2892_v62 = vsel %vm349_vm3, %v2890_v61, %v2845_v50 }
0x130a   :  { %v3764_v13 = vpop.eup %3763 }
0x130b   :  { %v2681_v42 = vmul.f32 %v3764_v13, %v3760_v5  ;;  %v2853_v54 = vpop.permute.xlu0 %2852 }
0x130c   :  { %v2895_v17 = vsel %vm2894_vm4, %v2892_v62, %v2853_v54  ;;  %v3037_v62 = vrot.slane %v4378_v51, %v3036_v57 }
0x130d   :  { %3595 = vmatmul.mubr.msk.f32.vlgmr.msra.gmra.mrb[34].mxu1 %vm349_vm3, %v2681_v42  ;;  %v3040_v42 = vld [vmem:[#allocation8] sm:$0xff] }
0x130e   :  { %v3646_v28 = vpack.c.bf16 %v3041_v53, %v3040_v42 }
0x130f   :  { %v2861_v56 = vpop.permute.xlu0 %2860 }
0x1310   :  { %v2898_v2 = vsel %vm2897_vm5, %v2895_v17, %v2861_v56  ;;  %3647 = vmatprep.subr.bf16.mxu1 %v3646_v28  ;;  %v3030_v56 = vsub.s32 3, %v4372_v23 }
0x1311   :  { %3649 = vmatpush3.bf16.msra.mxu1 %v3646_v28  ;;  %v3250_v28 = vsub.s32 5, %v4372_v23 }
0x1312   :  { %3651 = vmatprep.subr.bf16.mxu1 %v3650_v41 }
0x1313   :  { %v2869_v59 = vpop.permute.xlu0 %2868  ;;  %v3251_v43 = vrot.slane %v4378_v51, %v3250_v28 }
0x1314   :  { %v2901_v3 = vsel %vm2900_vm6, %v2898_v2, %v2869_v59  ;;  %v3031_v59 = vrot.slane %v4378_v51, %v3030_v56 }
0x1315   :  { %3653 = vmatpush3.bf16.msra.mxu1 %v3650_v41 }
0x1317   :  { %v2877_v63 = vpop.permute.xlu0 %2876 }
0x1318   :  { %v2904_v4 = vsel %vm2903_vm8, %v2901_v3, %v2877_v63 }
0x13d3   :  { %v2754_v45 = vpop.f32.mrb[28].mxu0 }
0x13d4   :  { %2884 = vrot.lane.b32.xlu0 %v2754_v45, %s3952_s2  ;;  %v3591_v46 = vpop.f32.mrb[29].mxu0  ;;  %v3132_v45 = vld [vmem:[#allocation10 + $0x8] sm:$0xff] }
0x13d5   :  { %v3654_v46 = vpack.c.bf16 %v3132_v45, %v3131_v44 }
0x13d7   :  { %3655 = vmatprep.subr.bf16.mxu0 %v3654_v46 }
0x13e0   :  { %v2830_v47 = vpop.f32.mrb[34].mxu1 }
0x13e1   :  { %2886 = vrot.lane.b32.xlu1 %v2830_v47, %s3952_s2  ;;  %v3596_v48 = vpop.f32.mrb[35].mxu1 }
0x1446   :  { %v2885_v6 = vpop.permute.xlu0 %2884 }
0x1447   :  { %v2907_v7 = vsel %vm2906_vm7, %v2904_v4, %v2885_v6  ;;  %v3133_v6 = vld [vmem:[#allocation10 + $0x10] sm:$0xff] }
0x1448   :  { %3605 = vmatprep.mubr.msk.f32.mxu0 %vm108_vm0, %v2907_v7  ;;  %v3134_v7 = vld [vmem:[#allocation10 + $0x18] sm:$0xff] }
0x1449   :  { %v3658_v49 = vpack.c.bf16 %v3134_v7, %v3133_v6 }
0x1453   :  { %v2887_v20 = vpop.permute.xlu1 %2886 }
0x1454   :  { %v2908_v21 = vsel %vm2906_vm7, %v2905_v18, %v2887_v20 }
0x1455   :  { %3606 = vmatmul.mubr.msk.f32.vlgmr.msra.gmra.mrb[30].mxu0 %vm108_vm0, %v2908_v21  ;;  %v3137_v21 = vsub.s32 2, %v4372_v23 }
0x1456   :  { %3657 = vmatpush3.bf16.msra.mxu0 %v3654_v46  ;;  %v3257_v46 = vrot.slane %v4378_v51, %v3256_v0 }
0x1457   :  { %3659 = vmatprep.subr.bf16.mxu0 %v3658_v49  ;;  %v3138_v22 = vrot.slane %v4378_v51, %v3137_v21 }
0x145a   :  { %3661 = vmatpush3.bf16.msra.mxu0 %v3658_v49 }
0x1528   :  { %v3607_v27 = vpop.f32.mrb[30].mxu0 }
0x1529   :  { %v2996_v29 = vadd.f32 %v3607_v27, %v2917_v26  ;;  %v2990_v30 = vpop.f32.mrb[31].mxu0 }
0x152a   :  { %v2991_v8 = vadd.f32 %v2990_v30, %v2917_v26 }
0x152b   :  { %v3000_v31 = vadd.f32 %v3773_v12, %v2996_v29 }
0x152c   :  { %v2999_v24 = vadd.f32 %v3774_v19, %v2991_v8 }
0x152d   :  { %v3004_v32 = vsel %vm108_vm0, %v3000_v31, 0.0 }
0x152e   :  { %3005 = vadd.xlane.f32.xlu1 %v3004_v32  ;;  %v3001_v34 = vsel %vm108_vm0, %v2999_v24, 0.0 }
0x152f   :  { %3002 = vadd.xlane.f32.xlu0 %v3001_v34 }
0x15bb   :  { %v3006_v58 = vpop.xlane.xlu1 %3005 }
0x15bc   :  { %v3009_v33 = vmul.f32 0.03125, %v3006_v58  ;;  %v3003_v5 = vpop.xlane.xlu0 %3002 }
0x15bd   :  { %v3008_v35 = vmul.f32 0.03125, %v3003_v5 }
0x15be   :  { %v3011_v36 = vsub.f32 %v3000_v31, %v3009_v33 }
0x15bf   :  { %v3010_v37 = vsub.f32 %v2999_v24, %v3008_v35 }
0x15c0   :  { %v3013_v40 = vmul.f32 %v3011_v36, %v3011_v36 }
0x15c1   :  { %v3012_v38 = vmul.f32 %v3010_v37, %v3010_v37 }
0x15c2   :  { %v3017_v13 = vsel %vm108_vm0, %v3013_v40, 0.0 }
0x15c3   :  { %v3014_v39 = vsel %vm108_vm0, %v3012_v38, 0.0 }
0x15c4   :  { %3015 = vadd.xlane.f32.xlu0 %v3014_v39 }
0x15c8   :  { %3018 = vadd.xlane.f32.xlu0 %v3017_v13 }
0x1651   :  { %v3016_v47 = vpop.xlane.xlu0 %3015 }
0x1652   :  { %v3020_v48 = vmul.f32 0.03125, %v3016_v47 }
0x1654   :  { %v3022_v50 = vadd.f32 1e-05, %v3020_v48 }
0x1655   :  { %v3019_v52 = vpop.xlane.xlu0 %3018 }
0x1656   :  { %3765 = vrsqrt.f32 %v3022_v50  ;;  %v3021_v54 = vmul.f32 0.03125, %v3019_v52 }
0x1658   :  { %v3023_v55 = vadd.f32 1e-05, %v3021_v54 }
0x165a   :  { %3767 = vrsqrt.f32 %v3023_v55 }
0x1660   :  { %v3766_v60 = vpop.eup %3765 }
0x1661   :  { %v3026_v61 = vmul.f32 %v3766_v60, %v3010_v37 }
0x1663   :  { %v3032_v63 = vmul.f32 %v3031_v59, %v3026_v61 }
0x1664   :  { %v3768_v1 = vpop.eup %3767 }
0x1665   :  { %v3027_v17 = vmul.f32 %v3768_v1, %v3011_v36  ;;  %v3038_v2 = vadd.f32 %v3037_v62, %v3032_v63 }
0x1667   :  { %v3033_v3 = vmul.f32 %v3031_v59, %v3027_v17  ;;  %3616 = vmatprep.mubr.msk.f32.mxu1 %vm108_vm0, %v3038_v2 }
0x1669   :  { %v3039_v4 = vadd.f32 %v3037_v62, %v3033_v3 }
0x166b   :  { %3617 = vmatmul.mubr.msk.f32.vlgmr.msra.gmra.mrb[36].mxu1 %vm108_vm0, %v3039_v4 }
0x173e   :  { %v3618_v10 = vpop.f32.mrb[36].mxu1 }
0x173f   :  { %v3126_v11 = vadd.f32 %v3618_v10, %v3047_v15  ;;  %v3120_v14 = vpop.f32.mrb[37].mxu1 }
0x1740   :  { %v3121_v16 = vadd.f32 %v3120_v14, %v3047_v15 }
0x1741   :  { %v3130_v20 = vmax.f32 %v3126_v11, 0.0 }
0x1742   :  { %v3129_v18 = vmax.f32 %v3121_v16, 0.0 }
0x1744   :  { %3627 = vmatprep.mubr.msk.f32.mxu0 %vm108_vm0, %v3129_v18 }
0x1745   :  { %3628 = vmatmul.mubr.msk.f32.vlgmr.msra.gmra.mrb[32].mxu0 %vm108_vm0, %v3130_v20 }
0x1818   :  { %v3629_v25 = vpop.f32.mrb[32].mxu0 }
0x1819   :  { %v3217_v26 = vadd.f32 %v3629_v25, %v3138_v22  ;;  %v3211_v27 = vpop.f32.mrb[33].mxu0 }
0x181a   :  { %v3212_v29 = vadd.f32 %v3211_v27, %v3138_v22 }
0x181b   :  { %v3221_v30 = vadd.f32 %v3217_v26, %v3039_v4 }
0x181c   :  { %v3220_v8 = vadd.f32 %v3212_v29, %v3038_v2 }
0x181d   :  { %v3225_v12 = vsel %vm108_vm0, %v3221_v30, 0.0 }
0x181e   :  { %3226 = vadd.xlane.f32.xlu0 %v3225_v12  ;;  %v3222_v31 = vsel %vm108_vm0, %v3220_v8, 0.0 }
0x181f   :  { %3223 = vadd.xlane.f32.xlu1 %v3222_v31 }
0x18ab   :  { %v3227_v19 = vpop.xlane.xlu0 %3226 }
0x18ac   :  { %v3229_v24 = vmul.f32 0.03125, %v3227_v19  ;;  %v3224_v32 = vpop.xlane.xlu1 %3223 }
0x18ad   :  { %v3228_v34 = vmul.f32 0.03125, %v3224_v32 }
0x18ae   :  { %v3231_v58 = vsub.f32 %v3221_v30, %v3229_v24 }
0x18af   :  { %v3230_v33 = vsub.f32 %v3220_v8, %v3228_v34 }
0x18b0   :  { %v3233_v5 = vmul.f32 %v3231_v58, %v3231_v58 }
0x18b1   :  { %v3232_v35 = vmul.f32 %v3230_v33, %v3230_v33 }
0x18b2   :  { %v3237_v36 = vsel %vm108_vm0, %v3233_v5, 0.0 }
0x18b3   :  { %3238 = vadd.xlane.f32.xlu0 %v3237_v36  ;;  %v3234_v37 = vsel %vm108_vm0, %v3232_v35, 0.0 }
0x18b4   :  { %3235 = vadd.xlane.f32.xlu1 %v3234_v37 }
0x1940   :  { %v3239_v38 = vpop.xlane.xlu0 %3238 }
0x1941   :  { %v3241_v39 = vmul.f32 0.03125, %v3239_v38  ;;  %v3236_v40 = vpop.xlane.xlu1 %3235 }
0x1942   :  { %v3240_v13 = vmul.f32 0.03125, %v3236_v40 }
0x1943   :  { %v3243_v42 = vadd.f32 1e-05, %v3241_v39 }
0x1944   :  { %v3242_v53 = vadd.f32 1e-05, %v3240_v13 }
0x1945   :  { %3769 = vrsqrt.f32 %v3243_v42 }
0x1946   :  { %3771 = vrsqrt.f32 %v3242_v53 }
0x194f   :  { %v3770_v41 = vpop.eup %3769 }
0x1950   :  { %v3772_v44 = vpop.eup %3771  ;;  %v3247_v45 = vmul.f32 %v3770_v41, %v3231_v58 }
0x1951   :  { %v3246_v47 = vmul.f32 %v3772_v44, %v3230_v33 }
0x1952   :  { %v3253_v48 = vmul.f32 %v3251_v43, %v3247_v45 }
0x1953   :  { %v3252_v50 = vmul.f32 %v3251_v43, %v3246_v47 }
0x1954   :  { %v3259_v52 = vadd.f32 %v3257_v46, %v3253_v48 }
0x1955   :  { %v3258_v54 = vadd.f32 %v3257_v46, %v3252_v50 }
0x1956   :  { %3261 = vst.msk [vmem:[#allocation11 + $0x8] sm:$0xff] %vm108_vm0, %v3259_v52 }
0x1957   :  { %3260 = vst.msk [vmem:[#allocation11] sm:$0xff] %vm108_vm0, %v3258_v54 }
0x1958   :  { %3896 = shalt.err (!%p3893_p2)
}
0x1959   :  { %s3897_s23 = scalar_lea.hbm %s4429_s7, 256 }
0x195a   :  { %p3898_p3 = scmp.ne.s32.totalorder %s4429_s7, %s3897_s23  ;;  %p3901_p4 = scmp.lt.u32.totalorder %s3897_s23, %s4429_s7 }
0x195c   :  { %p3903_p5 = pnand %p3901_p4, %p3898_p3 }
0x195e   :  { %3906 = shalt.err (!%p3903_p5)
}
0x195f   :  { %3273 = dma.vmem_to_hbm [thread:$0]  %s3268_s19, 256, %s4429_s7, [#allocation4], %s3917_s13, %s3917_s13, %s3918_s14  }
0x1960   :  { %3913 = dma.done.wait [#allocation4], 256  }
0x1961   :  { %3914 = vsyncadd [#allocation4], 4294967040 }
0x1962   :  { %3277 = vsyncpa [#allocation3], 1 }
0x1963   :  { %3278 = vsyncpa [#allocation6], 1 }
0x1964   :  { %3279 = vsyncpa [#allocation9], 1 }
0x1965   :  { %3280 = vsyncpa [#allocation4], 1 }

</bundles_post_ra>
